<compile_context>
chip_gen: v6e
topology: v6e:2x2x1
jax: 0.10.0
libtpu: 0.0.40
codegen_flags: <defaults>
</compile_context>

<pallas_src>
import jax
import jax.numpy as jnp
from jax.experimental import pallas as pl
from jax.experimental.pallas import tpu as pltpu


# ------------------------------ small helpers ------------------------------ #

def _round_up(x, m):
    return ((x + m - 1) // m) * m


def _pad2(a, rows, cols):
    return jnp.pad(a, ((0, rows - a.shape[0]), (0, cols - a.shape[1])))


# ------------------------------- fused kernel ------------------------------- #

def build_fused_call(n_pad, e_pad, g_pad, hp, h2p, outp, fvp, layers):
    f32, bf16 = jnp.float32, jnp.bfloat16
    const = lambda shape: pl.BlockSpec(shape, lambda l: (0, 0))
    per_layer = lambda r, c: pl.BlockSpec((None, r, c), lambda l: (l, 0, 0))

    def kernel(
        # inputs
        x0_hbm,                                   # pl.ANY (HBM), read once
        adj_ref, srcoh_ref, boh_ref, pool_ref, eoh_ref,
        pw1_ref, pb1_ref, pw2_ref, pb2_ref,
        bond_ref, conv_w_ref, m1_wv_ref, m1_wx_ref, m2_w_ref, ss_ref,
        # output
        out_ref,
        # scratch
        x_sc, vn_sc, dma_sem,
    ):
        l = pl.program_id(0)
        nl = pl.num_programs(0)

        @pl.when(l == 0)
        def _init():
            # x0 lives only in HBM; DMA it once into the carried node scratch.
            cp = pltpu.make_async_copy(x0_hbm, x_sc, dma_sem)
            cp.start()
            cp.wait()
            vn_sc[...] = jnp.zeros_like(vn_sc)

        vn = vn_sc[...]                                          # [G, HP] f32
        vn_bf = vn.astype(bf16)

        # x = x + virtualnode_embedding[batch]  (gather == bf16 one-hot matmul)
        vnb = jnp.dot(boh_ref[...], vn_bf, preferred_element_type=f32)
        x = x_sc[...].astype(f32) + vnb                          # [N, HP]

        # Bond embeddings rebuilt in-kernel from the tiny per-layer tables.
        eemb = jnp.dot(eoh_ref[...], bond_ref[...],
                       preferred_element_type=f32)               # [E, HP]

        # Packed per-layer BN-folded scale/shift rows.
        ss = ss_ref[...]                                         # [8, H2P] f32
        conv_s, conv_t = ss[0:1, :hp], ss[1:2, :hp]
        m1_s, m1_t = ss[2:3, :], ss[3:4, :]
        m2_s, m2_t = ss[4:5, :hp], ss[5:6, :hp]

        # ---- CombConv (GIN-style stand-in, see TODO at top) ----------------
        xsrc = jnp.dot(srcoh_ref[...], x.astype(bf16),
                       preferred_element_type=f32)               # [E, HP]
        msg = jnp.maximum(xsrc + eemb, 0.0).astype(bf16)
        agg = jnp.dot(adj_ref[...], msg, preferred_element_type=f32)  # [N, HP]
        h = (x + agg).astype(bf16)
        x_new = jnp.maximum(
            jnp.dot(h, conv_w_ref[...], preferred_element_type=f32)
            * conv_s + conv_t, 0.0)                              # [N, HP]

        # ---- virtualnode_mlp1 on cat([vn[batch], x]) without the concat ----
        vn_proj = jnp.dot(vn_bf, m1_wv_ref[...],
                          preferred_element_type=f32)            # [G, H2P]
        vnb_proj = jnp.dot(boh_ref[...], vn_proj.astype(bf16),
                           preferred_element_type=f32)           # [N, H2P]
        x_proj = jnp.dot(x_new.astype(bf16), m1_wx_ref[...],
                         preferred_element_type=f32)             # [N, H2P]
        vn_temp = jnp.maximum((vnb_proj + x_proj) * m1_s + m1_t, 0.0)

        # ---- global_add_pool (one-hot matmul) ------------------------------
        pooled = jnp.dot(pool_ref[...], vn_temp.astype(bf16),
                         preferred_element_type=f32)             # [G, H2P]

        # ---- virtualnode_mlp2 -----------------------------------------------
        vn_new = jnp.maximum(
            jnp.dot(pooled.astype(bf16), m2_w_ref[...],
                    preferred_element_type=f32) * m2_s + m2_t, 0.0)

        x_sc[...] = x_new.astype(bf16)
        vn_sc[...] = vn_new

        # ---- JK='L' + graph_pred_linear + clamp (eval) at the last layer ---
        @pl.when(l == nl - 1)
        def _final():
            h1 = jnp.maximum(
                jnp.dot(vn_new.astype(bf16), pw1_ref[...],
                        preferred_element_type=f32) + pb1_ref[...], 0.0)
            y = jnp.dot(h1.astype(bf16), pw2_ref[...],
                        preferred_element_type=f32) + pb2_ref[...]
            out_ref[...] = jnp.clip(y, 0.0, 50.0)

    in_specs = [
        pl.BlockSpec(memory_space=pl.ANY),   # x0 (read once at l==0 via DMA)
        const((n_pad, e_pad)),               # adj_t   (dst one-hot, scatter-add)
        const((e_pad, n_pad)),               # src_oh  (src gather)
        const((n_pad, g_pad)),               # batch_oh (vn[batch] gather)
        const((g_pad, n_pad)),               # pool_mat (= batch_oh.T)
        const((e_pad, fvp)),                 # bond-feature multi-hot
        const((hp, hp)),                     # pred_w1
        const((1, hp)),                      # pred_b1
        const((hp, outp)),                   # pred_w2
        const((1, outp)),                    # pred_b2
        per_layer(fvp, hp),                  # bond tables (stacked per feature)
        per_layer(hp, hp),                   # conv_w
        per_layer(hp, h2p),                  # m1_w (vn half)
        per_layer(hp, h2p),                  # m1_w (x half)
        per_layer(h2p, hp),                  # m2_w
        per_layer(8, h2p),                   # packed scale/shift rows
    ]
    return pl.pallas_call(
        kernel,
        out_shape=jax.ShapeDtypeStruct((g_pad, outp), jnp.float32),
        grid_spec=pltpu.PrefetchScalarGridSpec(
            num_scalar_prefetch=0,
            grid=(layers,),
            in_specs=in_specs,
            out_specs=pl.BlockSpec((g_pad, outp), lambda l: (0, 0)),
            scratch_shapes=[
                pltpu.VMEM((n_pad, hp), bf16),   # carried node states (bf16)
                pltpu.VMEM((g_pad, hp), f32),    # carried virtualnode embedding
                pltpu.SemaphoreType.DMA,         # for the one-time x0 load
            ]),
        compiler_params=pltpu.CompilerParams(
            dimension_semantics=("arbitrary",),   # layer recurrence: sequential
            vmem_limit_bytes=56 * 1024 * 1024),
    )


# ------------------------------ parameter init ------------------------------ #

def init_params(key, hidden, layers, num_atom_feats=9, num_bond_feats=3,
                atom_vocab=8, bond_vocab=4, num_tasks=1, eps=1e-5):
    keys = iter(jax.random.split(key, 1024))
    nrm = lambda shape, s=0.1: (s * jax.random.normal(next(keys), shape)
                                ).astype(jnp.float32)
    H, H2 = hidden, 2 * hidden

    def bn_fold(dim, lin_b):
        # eval-mode BN with nontrivial running stats, Linear bias folded in
        gamma = 1.0 + nrm((dim,))
        beta = nrm((dim,))
        r_mean = nrm((dim,))
        r_var = 1.0 + jnp.abs(nrm((dim,)))
        scale = gamma / jnp.sqrt(r_var + eps)
        shift = (lin_b - r_mean) * scale + beta
        return scale, shift

    params = {
        "atom_emb": [nrm((atom_vocab, H)) for _ in range(num_atom_feats)],
        "layers": [],
        "pred_w1": nrm((H, H)), "pred_b1": nrm((H,)),
        "pred_w2": nrm((H, num_tasks)), "pred_b2": nrm((num_tasks,)),
    }
    for _ in range(layers):
        conv_w, conv_b = nrm((H, H)), nrm((H,))
        conv_s, conv_t = bn_fold(H, conv_b)
        m1_w, m1_b = nrm((H2, H2)), nrm((H2,))
        m1_s, m1_t = bn_fold(H2, m1_b)
        m2_w, m2_b = nrm((H2, H)), nrm((H,))
        m2_s, m2_t = bn_fold(H, m2_b)
        params["layers"].append(dict(
            bond_emb=[nrm((bond_vocab, H)) for _ in range(num_bond_feats)],
            conv_w=conv_w, conv_s=conv_s, conv_t=conv_t,
            m1_w=m1_w, m1_s=m1_s, m1_t=m1_t,
            m2_w=m2_w, m2_s=m2_s, m2_t=m2_t))
    return params


def pack_params(params, hidden, hp, h2p, outp, fvp):
    H = hidden
    L = params["layers"]
    pw = lambda a, r, c: _pad2(a, r, c).astype(jnp.bfloat16)       # weights
    pv = lambda a, c: _pad2(a[None, :], 1, c).astype(jnp.float32)  # vectors

    def pack_ss(p):
        rows = jnp.concatenate([
            _pad2(p["conv_s"][None, :], 1, h2p),
            _pad2(p["conv_t"][None, :], 1, h2p),
            _pad2(p["m1_s"][None, :], 1, h2p),
            _pad2(p["m1_t"][None, :], 1, h2p),
            _pad2(p["m2_s"][None, :], 1, h2p),
            _pad2(p["m2_t"][None, :], 1, h2p),
            jnp.zeros((2, h2p), jnp.float32),
        ], axis=0)
        return rows.astype(jnp.float32)                            # [8, H2P]

    def pack_bond(p):
        tab = jnp.concatenate(p["bond_emb"], axis=0)               # [F*V, H]
        return pw(tab, fvp, hp)

    return {
        "bond_tab": jnp.stack([pack_bond(p) for p in L]),
        "conv_w": jnp.stack([pw(p["conv_w"], hp, hp) for p in L]),
        "m1_wv": jnp.stack([pw(p["m1_w"][:H], hp, h2p) for p in L]),
        "m1_wx": jnp.stack([pw(p["m1_w"][H:], hp, h2p) for p in L]),
        "m2_w": jnp.stack([pw(p["m2_w"], h2p, hp) for p in L]),
        "ss": jnp.stack([pack_ss(p) for p in L]),
        "pred_w1": pw(params["pred_w1"], hp, hp),
        "pred_b1": pv(params["pred_b1"], hp),
        "pred_w2": pw(params["pred_w2"], hp, outp),
        "pred_b2": pv(params["pred_b2"], outp),
    }


# -------------------------------- Net forward -------------------------------- #

def net_forward(params, x_feats, edge_index, edge_attr, batch, num_graphs,
                hidden, layers, bond_vocab):
    N, E, H = x_feats.shape[0], edge_index.shape[1], hidden
    F_bond = edge_attr.shape[1]
    num_tasks = params["pred_w2"].shape[1]
    HP = _round_up(max(H, 128), 128)
    H2P = _round_up(max(2 * H, 128), 128)
    OUTP = 128
    FVP = _round_up(max(F_bond * bond_vocab, 128), 128)
    N_PAD = _round_up(N, 16)
    E_PAD = _round_up(E, 16)
    G_PAD = _round_up(num_graphs, 16)

    # AtomEncoder: one-time embedding-table gathers (JAX glue), bf16 HBM slab.
    # TODO(synk): could be moved in-kernel via scalar-prefetched index tables.
    x0 = jnp.zeros((N, H), jnp.float32)
    for f in range(x_feats.shape[1]):
        x0 = x0 + params["atom_emb"][f][x_feats[:, f]]
    x0 = _pad2(x0, N_PAD, HP).astype(jnp.bfloat16)

    # Graph-topology one-hots in bf16 (0/1 exact). Padded entries use -1 -> zero.
    src = jnp.pad(edge_index[0], (0, E_PAD - E), constant_values=-1)
    dst = jnp.pad(edge_index[1], (0, E_PAD - E), constant_values=-1)
    bat = jnp.pad(batch, (0, N_PAD - N), constant_values=-1)
    adj_t = (dst[None, :] == jnp.arange(N_PAD)[:, None]).astype(jnp.bfloat16)
    src_oh = (src[:, None] == jnp.arange(N_PAD)[None, :]).astype(jnp.bfloat16)
    batch_oh = (bat[:, None] == jnp.arange(G_PAD)[None, :]).astype(jnp.bfloat16)
    pool_mat = batch_oh.T

    # Bond-feature multi-hot (constant across layers): [E_PAD, F*V] bf16.
    ea = jnp.pad(edge_attr, ((0, E_PAD - E), (0, 0)), constant_values=-1)
    col = jnp.where(ea >= 0, ea + jnp.arange(F_bond)[None, :] * bond_vocab, -1)
    eoh = (col[:, :, None] == jnp.arange(FVP)[None, None, :]
           ).astype(jnp.float32).sum(axis=1).astype(jnp.bfloat16)

    kp = pack_params(params, H, HP, H2P, OUTP, FVP)
    fused = build_fused_call(N_PAD, E_PAD, G_PAD, HP, H2P, OUTP, FVP, layers)
    out_pad = fused(
        x0, adj_t, src_oh, batch_oh, pool_mat, eoh,
        kp["pred_w1"], kp["pred_b1"], kp["pred_w2"], kp["pred_b2"],
        kp["bond_tab"], kp["conv_w"], kp["m1_wv"], kp["m1_wx"], kp["m2_w"],
        kp["ss"],
    )
    return out_pad[:num_graphs, :num_tasks]


# ---------------------------- pure-JAX reference ----------------------------- #

def reference_forward(params, x_feats, edge_index, edge_attr, batch, num_graphs,
                      hidden, layers):
    N, H = x_feats.shape[0], hidden
    x = jnp.zeros((N, H), jnp.float32)
    for f in range(x_feats.shape[1]):
        x = x + params["atom_emb"][f][x_feats[:, f]]
    vn = jnp.zeros((num_graphs, H), jnp.float32)
    src, dst = edge_index[0], edge_index[1]
    for lp in params["layers"]:
        e = jnp.zeros((edge_attr.shape[0], H), jnp.float32)
        for f in range(edge_attr.shape[1]):
            e = e + lp["bond_emb"][f][edge_attr[:, f]]
        xb = x + vn[batch]
        msg = jnp.maximum(xb[src] + e, 0.0)
        agg = jax.ops.segment_sum(msg, dst, num_segments=N)
        x = jnp.maximum((xb + agg) @ lp["conv_w"] * lp["conv_s"]
                        + lp["conv_t"], 0.0)
        cat = jnp.concatenate([vn[batch], x], axis=-1)
        vn_temp = jnp.maximum(cat @ lp["m1_w"] * lp["m1_s"] + lp["m1_t"], 0.0)
        pooled = jax.ops.segment_sum(vn_temp, batch, num_segments=num_graphs)
        vn = jnp.maximum(pooled @ lp["m2_w"] * lp["m2_s"] + lp["m2_t"], 0.0)
    h1 = jnp.maximum(vn @ params["pred_w1"] + params["pred_b1"], 0.0)
    y = h1 @ params["pred_w2"] + params["pred_b2"]
    return jnp.clip(y, 0.0, 50.0)


# ------------------------------------ main ----------------------------------- #

if __name__ == "__main__":
    HIDDEN, LAYERS = 32, 2
    N_NODES, N_EDGES, N_GRAPHS = 16, 32, 2
    ATOM_FEATS, BOND_FEATS = 9, 3
    ATOM_VOCAB, BOND_VOCAB = 8, 4

    key = jax.random.PRNGKey(0)
    k_par, k_x, k_e0, k_e1, k_ea = jax.random.split(key, 5)

    params = init_params(k_par, HIDDEN, LAYERS,
                         num_atom_feats=ATOM_FEATS, num_bond_feats=BOND_FEATS,
                         atom_vocab=ATOM_VOCAB, bond_vocab=BOND_VOCAB,
                         num_tasks=1)

    # synthetic batch: nodes 0..7 -> graph 0, nodes 8..15 -> graph 1
    x_feats = jax.random.randint(k_x, (N_NODES, ATOM_FEATS), 0, ATOM_VOCAB,
                                 dtype=jnp.int32)
    batch = jnp.concatenate([jnp.zeros(8, jnp.int32), jnp.ones(8, jnp.int32)])
    e0 = jax.random.randint(k_e0, (2, N_EDGES // 2), 0, 8, dtype=jnp.int32)
    e1 = jax.random.randint(k_e1, (2, N_EDGES // 2), 0, 8, dtype=jnp.int32) + 8
    edge_index = jnp.concatenate([e0, e1], axis=1)
    edge_attr = jax.random.randint(k_ea, (N_EDGES, BOND_FEATS), 0, BOND_VOCAB,
                                   dtype=jnp.int32)

    out = net_forward(params, x_feats, edge_index, edge_attr, batch,
                      N_GRAPHS, HIDDEN, LAYERS, BOND_VOCAB)
    out = jax.block_until_ready(out)
    ref = reference_forward(params, x_feats, edge_index, edge_attr, batch,
                            N_GRAPHS, HIDDEN, LAYERS)

    assert out.shape == (N_GRAPHS, 1)
    assert bool(jnp.all(jnp.isfinite(out)))
    assert bool(jnp.all(out >= 0.0)) and bool(jnp.all(out <= 50.0))
    assert bool(jnp.allclose(out, ref, atol=5e-2, rtol=5e-2)), (out, ref)
    print("KERNEL_OK")
</pallas_src>

<mosaic_0001>
module attributes {stable_mosaic.version = 11 : i64} {
  func.func @kernel(%arg0: i32, %arg1: memref<16x128xbf16, #tpu.memory_space<any>>, %arg2: memref<16x32xbf16, #tpu.memory_space<vmem>>, %arg3: memref<32x16xbf16, #tpu.memory_space<vmem>>, %arg4: memref<16x16xbf16, #tpu.memory_space<vmem>>, %arg5: memref<16x16xbf16, #tpu.memory_space<vmem>>, %arg6: memref<32x128xbf16, #tpu.memory_space<vmem>>, %arg7: memref<128x128xbf16, #tpu.memory_space<vmem>>, %arg8: memref<1x128xf32, #tpu.memory_space<vmem>>, %arg9: memref<128x128xbf16, #tpu.memory_space<vmem>>, %arg10: memref<1x128xf32, #tpu.memory_space<vmem>>, %arg11: memref<1x128x128xbf16, #tpu.memory_space<vmem>>, %arg12: memref<1x128x128xbf16, #tpu.memory_space<vmem>>, %arg13: memref<1x128x128xbf16, #tpu.memory_space<vmem>>, %arg14: memref<1x128x128xbf16, #tpu.memory_space<vmem>>, %arg15: memref<1x128x128xbf16, #tpu.memory_space<vmem>>, %arg16: memref<1x8x128xf32, #tpu.memory_space<vmem>>, %arg17: memref<16x128xf32, #tpu.memory_space<vmem>>, %arg18: memref<16x128xbf16, #tpu.memory_space<vmem>>, %arg19: memref<16x128xf32, #tpu.memory_space<vmem>>, %arg20: memref<!tpu.dma_semaphore, #tpu.memory_space<semaphore_mem>>) attributes {dimension_semantics = [#tpu.dimension_semantics<arbitrary>], iteration_bounds = array<i64: 2>, scalar_prefetch = 0 : i64, scratch_operands = 3 : i64, tpu.core_type = #tpu.core_type<tc>, window_params = [{}, {pipeline_mode = #tpu.pipeline_mode<synchronous>, transform_indices = @transform_1, window_bounds = array<i64: 16, 32>}, {pipeline_mode = #tpu.pipeline_mode<synchronous>, transform_indices = @transform_2, window_bounds = array<i64: 32, 16>}, {pipeline_mode = #tpu.pipeline_mode<synchronous>, transform_indices = @transform_3, window_bounds = array<i64: 16, 16>}, {pipeline_mode = #tpu.pipeline_mode<synchronous>, transform_indices = @transform_4, window_bounds = array<i64: 16, 16>}, {pipeline_mode = #tpu.pipeline_mode<synchronous>, transform_indices = @transform_5, window_bounds = array<i64: 32, 128>}, {pipeline_mode = #tpu.pipeline_mode<synchronous>, transform_indices = @transform_6, window_bounds = array<i64: 128, 128>}, {pipeline_mode = #tpu.pipeline_mode<synchronous>, transform_indices = @transform_7, window_bounds = array<i64: 1, 128>}, {pipeline_mode = #tpu.pipeline_mode<synchronous>, transform_indices = @transform_8, window_bounds = array<i64: 128, 128>}, {pipeline_mode = #tpu.pipeline_mode<synchronous>, transform_indices = @transform_9, window_bounds = array<i64: 1, 128>}, {transform_indices = @transform_10, window_bounds = array<i64: 1, 128, 128>}, {transform_indices = @transform_11, window_bounds = array<i64: 1, 128, 128>}, {transform_indices = @transform_12, window_bounds = array<i64: 1, 128, 128>}, {transform_indices = @transform_13, window_bounds = array<i64: 1, 128, 128>}, {transform_indices = @transform_14, window_bounds = array<i64: 1, 128, 128>}, {transform_indices = @transform_15, window_bounds = array<i64: 1, 8, 128>}, {pipeline_mode = #tpu.pipeline_mode<synchronous>, transform_indices = @transform_16, window_bounds = array<i64: 16, 128>}]} {
    %c0_i32 = arith.constant 0 : i32
    %0 = arith.cmpi eq, %arg0, %c0_i32 : i32
    %1 = arith.extui %0 : i1 to i32
    %c0_i32_0 = arith.constant 0 : i32
    %2 = arith.cmpi ne, %1, %c0_i32_0 : i32
    scf.if %2 {
      tpu.enqueue_dma source(%arg1 : memref<16x128xbf16, #tpu.memory_space<any>>) target(%arg18 : memref<16x128xbf16, #tpu.memory_space<vmem>>) target_semaphore(%arg20 : memref<!tpu.dma_semaphore, #tpu.memory_space<semaphore_mem>>)
      tpu.wait_dma2 semaphore(%arg20 : memref<!tpu.dma_semaphore, #tpu.memory_space<semaphore_mem>>) src(%arg1 : memref<16x128xbf16, #tpu.memory_space<any>>) dst(%arg18 : memref<16x128xbf16, #tpu.memory_space<vmem>>)
      %cst_52 = arith.constant 0.000000e+00 : f32
      %78 = vector.broadcast %cst_52 : f32 to vector<16x128xf32>
      %c0_53 = arith.constant 0 : index
      %c0_54 = arith.constant 0 : index
      %79 = vector.load %arg19[%c0_53, %c0_54] : memref<16x128xf32, #tpu.memory_space<vmem>>, vector<16x128xf32>
      tpu.vector_store %arg19[%c0_53, %c0_54], %78 {strides = array<i32>} : memref<16x128xf32, #tpu.memory_space<vmem>>, vector<16x128xf32>,
    } else {
    }
    %c0 = arith.constant 0 : index
    %c0_1 = arith.constant 0 : index
    %3 = vector.load %arg19[%c0, %c0_1] : memref<16x128xf32, #tpu.memory_space<vmem>>, vector<16x128xf32>
    %4 = arith.truncf %3 : vector<16x128xf32> to vector<16x128xbf16>
    %c0_2 = arith.constant 0 : index
    %c0_3 = arith.constant 0 : index
    %5 = vector.load %arg4[%c0_2, %c0_3] : memref<16x16xbf16, #tpu.memory_space<vmem>>, vector<16x16xbf16>
    %cst = arith.constant dense<0.000000e+00> : vector<16x128xf32>
    %6 = tpu.matmul %5, %4, %cst {dimension_numbers = #tpu.dot_dimension_numbers<[1], [0], [0], [1], [0, 0, 1, 1], [], []>} : vector<16x16xbf16>, vector<16x128xbf16>, vector<16x128xf32> -> vector<16x128xf32>
    %c0_4 = arith.constant 0 : index
    %c0_5 = arith.constant 0 : index
    %7 = vector.load %arg18[%c0_4, %c0_5] : memref<16x128xbf16, #tpu.memory_space<vmem>>, vector<16x128xbf16>
    %8 = arith.extf %7 : vector<16x128xbf16> to vector<16x128xf32>
    %9 = arith.addf %8, %6 : vector<16x128xf32>
    %c0_6 = arith.constant 0 : index
    %c0_7 = arith.constant 0 : index
    %10 = vector.load %arg6[%c0_6, %c0_7] : memref<32x128xbf16, #tpu.memory_space<vmem>>, vector<32x128xbf16>
    %c0_8 = arith.constant 0 : index
    %c0_9 = arith.constant 0 : index
    %c0_10 = arith.constant 0 : index
    %11 = vector.load %arg11[%c0_8, %c0_9, %c0_10] : memref<1x128x128xbf16, #tpu.memory_space<vmem>>, vector<1x128x128xbf16>
    %12 = vector.shape_cast %11 : vector<1x128x128xbf16> to vector<128x128xbf16>
    %cst_11 = arith.constant dense<0.000000e+00> : vector<32x128xf32>
    %13 = tpu.matmul %10, %12, %cst_11 {dimension_numbers = #tpu.dot_dimension_numbers<[1], [0], [0], [1], [0, 0, 1, 1], [], []>} : vector<32x128xbf16>, vector<128x128xbf16>, vector<32x128xf32> -> vector<32x128xf32>
    %c0_12 = arith.constant 0 : index
    %c0_13 = arith.constant 0 : index
    %c0_14 = arith.constant 0 : index
    %14 = vector.load %arg16[%c0_12, %c0_13, %c0_14] : memref<1x8x128xf32, #tpu.memory_space<vmem>>, vector<1x8x128xf32>
    %15 = vector.shape_cast %14 : vector<1x8x128xf32> to vector<8x128xf32>
    %16 = vector.extract_strided_slice %15 {offsets = [0, 0], sizes = [1, 128], strides = [1, 1]} : vector<8x128xf32> to vector<1x128xf32>
    %17 = vector.extract_strided_slice %15 {offsets = [1, 0], sizes = [1, 128], strides = [1, 1]} : vector<8x128xf32> to vector<1x128xf32>
    %18 = vector.extract_strided_slice %15 {offsets = [2, 0], sizes = [1, 128], strides = [1, 1]} : vector<8x128xf32> to vector<1x128xf32>
    %19 = vector.extract_strided_slice %15 {offsets = [3, 0], sizes = [1, 128], strides = [1, 1]} : vector<8x128xf32> to vector<1x128xf32>
    %20 = vector.extract_strided_slice %15 {offsets = [4, 0], sizes = [1, 128], strides = [1, 1]} : vector<8x128xf32> to vector<1x128xf32>
    %21 = vector.extract_strided_slice %15 {offsets = [5, 0], sizes = [1, 128], strides = [1, 1]} : vector<8x128xf32> to vector<1x128xf32>
    %c0_15 = arith.constant 0 : index
    %c0_16 = arith.constant 0 : index
    %22 = vector.load %arg3[%c0_15, %c0_16] : memref<32x16xbf16, #tpu.memory_space<vmem>>, vector<32x16xbf16>
    %23 = arith.truncf %9 : vector<16x128xf32> to vector<16x128xbf16>
    %cst_17 = arith.constant dense<0.000000e+00> : vector<32x128xf32>
    %24 = tpu.matmul %22, %23, %cst_17 {dimension_numbers = #tpu.dot_dimension_numbers<[1], [0], [0], [1], [0, 0, 1, 1], [], []>} : vector<32x16xbf16>, vector<16x128xbf16>, vector<32x128xf32> -> vector<32x128xf32>
    %25 = arith.addf %24, %13 : vector<32x128xf32>
    %cst_18 = arith.constant 0.000000e+00 : f32
    %26 = vector.broadcast %cst_18 : f32 to vector<32x128xf32>
    %27 = arith.maximumf %25, %26 : vector<32x128xf32>
    %28 = arith.truncf %27 : vector<32x128xf32> to vector<32x128xbf16>
    %c0_19 = arith.constant 0 : index
    %c0_20 = arith.constant 0 : index
    %29 = vector.load %arg2[%c0_19, %c0_20] : memref<16x32xbf16, #tpu.memory_space<vmem>>, vector<16x32xbf16>
    %cst_21 = arith.constant dense<0.000000e+00> : vector<16x128xf32>
    %30 = tpu.matmul %29, %28, %cst_21 {dimension_numbers = #tpu.dot_dimension_numbers<[1], [0], [0], [1], [0, 0, 1, 1], [], []>} : vector<16x32xbf16>, vector<32x128xbf16>, vector<16x128xf32> -> vector<16x128xf32>
    %31 = arith.addf %9, %30 : vector<16x128xf32>
    %32 = arith.truncf %31 : vector<16x128xf32> to vector<16x128xbf16>
    %c0_22 = arith.constant 0 : index
    %c0_23 = arith.constant 0 : index
    %c0_24 = arith.constant 0 : index
    %33 = vector.load %arg12[%c0_22, %c0_23, %c0_24] : memref<1x128x128xbf16, #tpu.memory_space<vmem>>, vector<1x128x128xbf16>
    %34 = vector.shape_cast %33 : vector<1x128x128xbf16> to vector<128x128xbf16>
    %cst_25 = arith.constant dense<0.000000e+00> : vector<16x128xf32>
    %35 = tpu.matmul %32, %34, %cst_25 {dimension_numbers = #tpu.dot_dimension_numbers<[1], [0], [0], [1], [0, 0, 1, 1], [], []>} : vector<16x128xbf16>, vector<128x128xbf16>, vector<16x128xf32> -> vector<16x128xf32>
    %36 = vector.broadcast %16 : vector<1x128xf32> to vector<16x128xf32>
    %37 = arith.mulf %35, %36 : vector<16x128xf32>
    %38 = vector.broadcast %17 : vector<1x128xf32> to vector<16x128xf32>
    %39 = arith.addf %37, %38 : vector<16x128xf32>
    %cst_26 = arith.constant 0.000000e+00 : f32
    %40 = vector.broadcast %cst_26 : f32 to vector<16x128xf32>
    %41 = arith.maximumf %39, %40 : vector<16x128xf32>
    %c0_27 = arith.constant 0 : index
    %c0_28 = arith.constant 0 : index
    %c0_29 = arith.constant 0 : index
    %42 = vector.load %arg13[%c0_27, %c0_28, %c0_29] : memref<1x128x128xbf16, #tpu.memory_space<vmem>>, vector<1x128x128xbf16>
    %43 = vector.shape_cast %42 : vector<1x128x128xbf16> to vector<128x128xbf16>
    %cst_30 = arith.constant dense<0.000000e+00> : vector<16x128xf32>
    %44 = tpu.matmul %4, %43, %cst_30 {dimension_numbers = #tpu.dot_dimension_numbers<[1], [0], [0], [1], [0, 0, 1, 1], [], []>} : vector<16x128xbf16>, vector<128x128xbf16>, vector<16x128xf32> -> vector<16x128xf32>
    %c0_31 = arith.constant 0 : index
    %c0_32 = arith.constant 0 : index
    %45 = vector.load %arg4[%c0_31, %c0_32] : memref<16x16xbf16, #tpu.memory_space<vmem>>, vector<16x16xbf16>
    %46 = arith.truncf %44 : vector<16x128xf32> to vector<16x128xbf16>
    %cst_33 = arith.constant dense<0.000000e+00> : vector<16x128xf32>
    %47 = tpu.matmul %45, %46, %cst_33 {dimension_numbers = #tpu.dot_dimension_numbers<[1], [0], [0], [1], [0, 0, 1, 1], [], []>} : vector<16x16xbf16>, vector<16x128xbf16>, vector<16x128xf32> -> vector<16x128xf32>
    %48 = arith.truncf %41 : vector<16x128xf32> to vector<16x128xbf16>
    %c0_34 = arith.constant 0 : index
    %c0_35 = arith.constant 0 : index
    %c0_36 = arith.constant 0 : index
    %49 = vector.load %arg14[%c0_34, %c0_35, %c0_36] : memref<1x128x128xbf16, #tpu.memory_space<vmem>>, vector<1x128x128xbf16>
    %50 = vector.shape_cast %49 : vector<1x128x128xbf16> to vector<128x128xbf16>
    %cst_37 = arith.constant dense<0.000000e+00> : vector<16x128xf32>
    %51 = tpu.matmul %48, %50, %cst_37 {dimension_numbers = #tpu.dot_dimension_numbers<[1], [0], [0], [1], [0, 0, 1, 1], [], []>} : vector<16x128xbf16>, vector<128x128xbf16>, vector<16x128xf32> -> vector<16x128xf32>
    %52 = arith.addf %47, %51 : vector<16x128xf32>
    %53 = vector.broadcast %18 : vector<1x128xf32> to vector<16x128xf32>
    %54 = arith.mulf %52, %53 : vector<16x128xf32>
    %55 = vector.broadcast %19 : vector<1x128xf32> to vector<16x128xf32>
    %56 = arith.addf %54, %55 : vector<16x128xf32>
    %cst_38 = arith.constant 0.000000e+00 : f32
    %57 = vector.broadcast %cst_38 : f32 to vector<16x128xf32>
    %58 = arith.maximumf %56, %57 : vector<16x128xf32>
    %c0_39 = arith.constant 0 : index
    %c0_40 = arith.constant 0 : index
    %59 = vector.load %arg5[%c0_39, %c0_40] : memref<16x16xbf16, #tpu.memory_space<vmem>>, vector<16x16xbf16>
    %60 = arith.truncf %58 : vector<16x128xf32> to vector<16x128xbf16>
    %cst_41 = arith.constant dense<0.000000e+00> : vector<16x128xf32>
    %61 = tpu.matmul %59, %60, %cst_41 {dimension_numbers = #tpu.dot_dimension_numbers<[1], [0], [0], [1], [0, 0, 1, 1], [], []>} : vector<16x16xbf16>, vector<16x128xbf16>, vector<16x128xf32> -> vector<16x128xf32>
    %62 = arith.truncf %61 : vector<16x128xf32> to vector<16x128xbf16>
    %c0_42 = arith.constant 0 : index
    %c0_43 = arith.constant 0 : index
    %c0_44 = arith.constant 0 : index
    %63 = vector.load %arg15[%c0_42, %c0_43, %c0_44] : memref<1x128x128xbf16, #tpu.memory_space<vmem>>, vector<1x128x128xbf16>
    %64 = vector.shape_cast %63 : vector<1x128x128xbf16> to vector<128x128xbf16>
    %cst_45 = arith.constant dense<0.000000e+00> : vector<16x128xf32>
    %65 = tpu.matmul %62, %64, %cst_45 {dimension_numbers = #tpu.dot_dimension_numbers<[1], [0], [0], [1], [0, 0, 1, 1], [], []>} : vector<16x128xbf16>, vector<128x128xbf16>, vector<16x128xf32> -> vector<16x128xf32>
    %66 = vector.broadcast %20 : vector<1x128xf32> to vector<16x128xf32>
    %67 = arith.mulf %65, %66 : vector<16x128xf32>
    %68 = vector.broadcast %21 : vector<1x128xf32> to vector<16x128xf32>
    %69 = arith.addf %67, %68 : vector<16x128xf32>
    %cst_46 = arith.constant 0.000000e+00 : f32
    %70 = vector.broadcast %cst_46 : f32 to vector<16x128xf32>
    %71 = arith.maximumf %69, %70 : vector<16x128xf32>
    %72 = arith.truncf %41 : vector<16x128xf32> to vector<16x128xbf16>
    %c0_47 = arith.constant 0 : index
    %c0_48 = arith.constant 0 : index
    %73 = vector.load %arg18[%c0_47, %c0_48] : memref<16x128xbf16, #tpu.memory_space<vmem>>, vector<16x128xbf16>
    tpu.vector_store %arg18[%c0_47, %c0_48], %72 {strides = array<i32>} : memref<16x128xbf16, #tpu.memory_space<vmem>>, vector<16x128xbf16>,
    %c0_49 = arith.constant 0 : index
    %c0_50 = arith.constant 0 : index
    %74 = vector.load %arg19[%c0_49, %c0_50] : memref<16x128xf32, #tpu.memory_space<vmem>>, vector<16x128xf32>
    tpu.vector_store %arg19[%c0_49, %c0_50], %71 {strides = array<i32>} : memref<16x128xf32, #tpu.memory_space<vmem>>, vector<16x128xf32>,
    %c1_i32 = arith.constant 1 : i32
    %75 = arith.cmpi eq, %arg0, %c1_i32 : i32
    %76 = arith.extui %75 : i1 to i32
    %c0_i32_51 = arith.constant 0 : i32
    %77 = arith.cmpi ne, %76, %c0_i32_51 : i32
    scf.if %77 {
      %78 = arith.truncf %71 : vector<16x128xf32> to vector<16x128xbf16>
      %c0_52 = arith.constant 0 : index
      %c0_53 = arith.constant 0 : index
      %79 = vector.load %arg7[%c0_52, %c0_53] : memref<128x128xbf16, #tpu.memory_space<vmem>>, vector<128x128xbf16>
      %cst_54 = arith.constant dense<0.000000e+00> : vector<16x128xf32>
      %80 = tpu.matmul %78, %79, %cst_54 {dimension_numbers = #tpu.dot_dimension_numbers<[1], [0], [0], [1], [0, 0, 1, 1], [], []>} : vector<16x128xbf16>, vector<128x128xbf16>, vector<16x128xf32> -> vector<16x128xf32>
      %c0_55 = arith.constant 0 : index
      %c0_56 = arith.constant 0 : index
      %81 = vector.load %arg8[%c0_55, %c0_56] : memref<1x128xf32, #tpu.memory_space<vmem>>, vector<1x128xf32>
      %82 = vector.broadcast %81 : vector<1x128xf32> to vector<16x128xf32>
      %83 = arith.addf %80, %82 : vector<16x128xf32>
      %cst_57 = arith.constant 0.000000e+00 : f32
      %84 = vector.broadcast %cst_57 : f32 to vector<16x128xf32>
      %85 = arith.maximumf %83, %84 : vector<16x128xf32>
      %86 = arith.truncf %85 : vector<16x128xf32> to vector<16x128xbf16>
      %c0_58 = arith.constant 0 : index
      %c0_59 = arith.constant 0 : index
      %87 = vector.load %arg9[%c0_58, %c0_59] : memref<128x128xbf16, #tpu.memory_space<vmem>>, vector<128x128xbf16>
      %cst_60 = arith.constant dense<0.000000e+00> : vector<16x128xf32>
      %88 = tpu.matmul %86, %87, %cst_60 {dimension_numbers = #tpu.dot_dimension_numbers<[1], [0], [0], [1], [0, 0, 1, 1], [], []>} : vector<16x128xbf16>, vector<128x128xbf16>, vector<16x128xf32> -> vector<16x128xf32>
      %c0_61 = arith.constant 0 : index
      %c0_62 = arith.constant 0 : index
      %89 = vector.load %arg10[%c0_61, %c0_62] : memref<1x128xf32, #tpu.memory_space<vmem>>, vector<1x128xf32>
      %90 = vector.broadcast %89 : vector<1x128xf32> to vector<16x128xf32>
      %91 = arith.addf %88, %90 : vector<16x128xf32>
      %cst_63 = arith.constant 0.000000e+00 : f32
      %cst_64 = arith.constant 5.000000e+01 : f32
      %92 = vector.broadcast %cst_63 : f32 to vector<16x128xf32>
      %93 = arith.maximumf %92, %91 : vector<16x128xf32>
      %94 = vector.broadcast %cst_64 : f32 to vector<16x128xf32>
      %95 = arith.minimumf %94, %93 : vector<16x128xf32>
      %c0_65 = arith.constant 0 : index
      %c0_66 = arith.constant 0 : index
      %96 = vector.load %arg17[%c0_65, %c0_66] : memref<16x128xf32, #tpu.memory_space<vmem>>, vector<16x128xf32>
      tpu.vector_store %arg17[%c0_65, %c0_66], %95 {strides = array<i32>} : memref<16x128xf32, #tpu.memory_space<vmem>>, vector<16x128xf32>,
    } else {
    }
    return
  }
  func.func @transform_1(%arg0: i32) -> (i32, i32) {
    %c0_i32 = arith.constant 0 : i32
    %c0_i32_0 = arith.constant 0 : i32
    %c0_i32_1 = arith.constant 0 : i32
    return %c0_i32, %c0_i32_0 : i32, i32
  }
  func.func @transform_2(%arg0: i32) -> (i32, i32) {
    %c0_i32 = arith.constant 0 : i32
    %c0_i32_0 = arith.constant 0 : i32
    %c0_i32_1 = arith.constant 0 : i32
    return %c0_i32, %c0_i32_0 : i32, i32
  }
  func.func @transform_3(%arg0: i32) -> (i32, i32) {
    %c0_i32 = arith.constant 0 : i32
    %c0_i32_0 = arith.constant 0 : i32
    %c0_i32_1 = arith.constant 0 : i32
    return %c0_i32, %c0_i32_0 : i32, i32
  }
  func.func @transform_4(%arg0: i32) -> (i32, i32) {
    %c0_i32 = arith.constant 0 : i32
    %c0_i32_0 = arith.constant 0 : i32
    %c0_i32_1 = arith.constant 0 : i32
    return %c0_i32, %c0_i32_0 : i32, i32
  }
  func.func @transform_5(%arg0: i32) -> (i32, i32) {
    %c0_i32 = arith.constant 0 : i32
    %c0_i32_0 = arith.constant 0 : i32
    %c0_i32_1 = arith.constant 0 : i32
    return %c0_i32, %c0_i32_0 : i32, i32
  }
  func.func @transform_6(%arg0: i32) -> (i32, i32) {
    %c0_i32 = arith.constant 0 : i32
    %c0_i32_0 = arith.constant 0 : i32
    %c0_i32_1 = arith.constant 0 : i32
    return %c0_i32, %c0_i32_0 : i32, i32
  }
  func.func @transform_7(%arg0: i32) -> (i32, i32) {
    %c0_i32 = arith.constant 0 : i32
    %c0_i32_0 = arith.constant 0 : i32
    %c0_i32_1 = arith.constant 0 : i32
    return %c0_i32, %c0_i32_0 : i32, i32
  }
  func.func @transform_8(%arg0: i32) -> (i32, i32) {
    %c0_i32 = arith.constant 0 : i32
    %c0_i32_0 = arith.constant 0 : i32
    %c0_i32_1 = arith.constant 0 : i32
    return %c0_i32, %c0_i32_0 : i32, i32
  }
  func.func @transform_9(%arg0: i32) -> (i32, i32) {
    %c0_i32 = arith.constant 0 : i32
    %c0_i32_0 = arith.constant 0 : i32
    %c0_i32_1 = arith.constant 0 : i32
    return %c0_i32, %c0_i32_0 : i32, i32
  }
  func.func @transform_10(%arg0: i32) -> (i32, i32, i32) {
    %c0_i32 = arith.constant 0 : i32
    %c0_i32_0 = arith.constant 0 : i32
    %c0_i32_1 = arith.constant 0 : i32
    return %arg0, %c0_i32, %c0_i32_0 : i32, i32, i32
  }
  func.func @transform_11(%arg0: i32) -> (i32, i32, i32) {
    %c0_i32 = arith.constant 0 : i32
    %c0_i32_0 = arith.constant 0 : i32
    %c0_i32_1 = arith.constant 0 : i32
    return %arg0, %c0_i32, %c0_i32_0 : i32, i32, i32
  }
  func.func @transform_12(%arg0: i32) -> (i32, i32, i32) {
    %c0_i32 = arith.constant 0 : i32
    %c0_i32_0 = arith.constant 0 : i32
    %c0_i32_1 = arith.constant 0 : i32
    return %arg0, %c0_i32, %c0_i32_0 : i32, i32, i32
  }
  func.func @transform_13(%arg0: i32) -> (i32, i32, i32) {
    %c0_i32 = arith.constant 0 : i32
    %c0_i32_0 = arith.constant 0 : i32
    %c0_i32_1 = arith.constant 0 : i32
    return %arg0, %c0_i32, %c0_i32_0 : i32, i32, i32
  }
  func.func @transform_14(%arg0: i32) -> (i32, i32, i32) {
    %c0_i32 = arith.constant 0 : i32
    %c0_i32_0 = arith.constant 0 : i32
    %c0_i32_1 = arith.constant 0 : i32
    return %arg0, %c0_i32, %c0_i32_0 : i32, i32, i32
  }
  func.func @transform_15(%arg0: i32) -> (i32, i32, i32) {
    %c0_i32 = arith.constant 0 : i32
    %c0_i32_0 = arith.constant 0 : i32
    %c0_i32_1 = arith.constant 0 : i32
    return %arg0, %c0_i32, %c0_i32_0 : i32, i32, i32
  }
  func.func @transform_16(%arg0: i32) -> (i32, i32) {
    %c0_i32 = arith.constant 0 : i32
    %c0_i32_0 = arith.constant 0 : i32
    %c0_i32_1 = arith.constant 0 : i32
    return %c0_i32, %c0_i32_0 : i32, i32
  }
}

</mosaic_0001>

<bundles_post_ra>
// kernel: tpu_custom_call.1
= control target key start
LH: loop header
LB: loop body
LE: loop exit
PB: predicated region body
PF: predicated region fallthrough
CT: control target
= control target key end

     0   :  { %s3683_s0 = inlined_call_operand.hbm [shape: bf16[16,128], index: 0, kind: input, shape index: {}]   ;;  %s3684_s1 = inlined_call_operand.hbm [shape: bf16[16,32], index: 1, kind: input, shape index: {}]   ;;  %s3685_s2 = inlined_call_operand.vmem [shape: bf16[32,16], index: 2, kind: input, shape index: {}]   ;;  %s3686_s3 = inlined_call_operand.hbm [shape: bf16[16,16], index: 3, kind: input, shape index: {}]   ;;  %s3687_s4 = inlined_call_operand.hbm [shape: bf16[16,16], index: 4, kind: input, shape index: {}]   ;;  %s3688_s5 = inlined_call_operand.vmem [shape: bf16[32,128], index: 5, kind: input, shape index: {}]   ;;  %s3689_s6 = inlined_call_operand.hbm [shape: bf16[128,128], index: 6, kind: input, shape index: {}]   ;;  %s3690_s7 = inlined_call_operand.vmem [shape: f32[1,128], index: 7, kind: input, shape index: {}]   ;;  %s3691_s8 = inlined_call_operand.hbm [shape: bf16[128,128], index: 8, kind: input, shape index: {}]   ;;  %s3692_s9 = inlined_call_operand.vmem [shape: f32[1,128], index: 9, kind: input, shape index: {}]   ;;  %s3693_s10 = inlined_call_operand.hbm [shape: bf16[2,128,128], index: 10, kind: input, shape index: {}]   ;;  %s3694_s11 = inlined_call_operand.hbm [shape: bf16[2,128,128], index: 11, kind: input, shape index: {}]   ;;  %s3695_s12 = inlined_call_operand.hbm [shape: bf16[2,128,128], index: 12, kind: input, shape index: {}]   ;;  %s3696_s13 = inlined_call_operand.hbm [shape: bf16[2,128,128], index: 13, kind: input, shape index: {}]   ;;  %s3697_s14 = inlined_call_operand.hbm [shape: bf16[2,128,128], index: 14, kind: input, shape index: {}]   ;;  %s3698_s15 = inlined_call_operand.vmem [shape: f32[2,8,128], index: 15, kind: input, shape index: {}]   ;;  %s3699_s16 = inlined_call_operand.hbm [shape: f32[16,128], index: 16, kind: output, shape index: {}]  }
   0x1   :  { %3723 = sst [smem:[#allocation41_spill]] %s3683_s0 }
   0x2   :  { %3724 = sst [smem:[#allocation42_spill]] %s3685_s2 }
   0x3   :  { %3725 = sst [smem:[#allocation43_spill]] %s3686_s3 }
   0x4   :  { %3726 = sst [smem:[#allocation44_spill]] %s3688_s5 }
   0x5   :  { %3727 = sst [smem:[#allocation45_spill]] %s3689_s6 }
   0x6   :  { %3728 = sst [smem:[#allocation46_spill]] %s3690_s7 }
   0x7   :  { %3729 = sst [smem:[#allocation47_spill]] %s3692_s9 }
   0x8   :  { %3730 = sst [smem:[#allocation48_spill]] %s3693_s10 }
   0x9   :  { %3731 = sst [smem:[#allocation49_spill]] %s3698_s15 }
   0xa   :  { %3732 = sst [smem:[#allocation50_spill]] %s3699_s16 }
   0xb   :  { %21 = vsyncpa [#allocation6], 0 }
   0xc   :  { %22 = vsyncpa [#allocation9], 0 }
   0xd   :  { %23 = vsyncpa [#allocation12], 0 }
   0xe   :  { %24 = vsyncpa [#allocation15], 0 }
   0xf   :  { %26 = vsyncpa [#allocation15 + $0x1], 0 }
  0x10   :  { %27 = vsyncpa [#allocation18], 0 }
  0x11   :  { %29 = vsyncpa [#allocation18 + $0x1], 0 }
  0x12   :  { %30 = vsyncpa [#allocation21], 0 }
  0x13   :  { %32 = vsyncpa [#allocation21 + $0x1], 0 }
  0x14   :  { %33 = vsyncpa [#allocation7], 0  ;;  %s3161_s21 = smov 0   ;;  %s3163_s22 = smov 0  }
  0x15   :  { %s3165_s23 = smov 0   ;;  %s3167_s24 = smov 0  }
  0x16 LB: > { %3733 = sst [smem:[#allocation35_spill]] %s3045_s22  ;;  %s3180_s25 = sadd.s32 4294967295, %s3053_s24   ;;  %s3053_s24 = sphi %s3167_s24, %s3778_s24   ;;  %s3049_s23 = sphi %s3165_s23, %s3782_s23   ;;  %s3045_s22 = sphi %s3163_s22, %s3781_s22   ;;  %s3041_s21 = sphi %s3161_s21, %s3779_s21  }
  0x17   : > { %3734 = sst [smem:[#allocation36_spill]] %s3180_s25  ;;  %p248_p0 = scmp.ne.s32.totalorder %s3045_s22, %s3041_s21 }
  0x18   : > { %p3709_p1 = scmp.eq.s32.totalorder %s3180_s25, 0  ;;  %p2111_p2 = scmp.ge.s32.totalorder %s3053_s24, 1 }
  0x19   : > { %p410_p3 = scmp.lt.s32.totalorder %s3053_s24, 3  ;;  %s3055_s28 = smov [#allocation8]  }
  0x1a   : > { %p3189_p5 = por %p3709_p1, %p248_p0  ;;  %s438_s29 = sshll.u32 %s3055_s28, 4  ;;  %s439_s29 = int_to_ptr.vmem [resolvable:$true] %s438_s29 }
  0x1b   : > { %p3193_p6 = pnand %p2111_p2, %p410_p3  ;;  %s3056_s0 = smov [#allocation11]  }
  0x1c   : > { %s3735_s26 = scalar_select %p3189_p5, 1, 0 }
  0x1d   : > { %s3737_s27 = scalar_select %p3193_p6, 1, 0 }
  0x1e   : > { %3736 = sst [smem:[#allocation37_spill]] %s3735_s26  ;;  %p2523_p7 = pneg %p3193_p6 }
  0x1f   : > { %3738 = sst [smem:[#allocation38_spill]] %s3737_s27  ;;  %s467_s17 = sshll.u32 %s3056_s0, 4  ;;  %s468_s17 = int_to_ptr.vmem [resolvable:$true] %s467_s17 }
  0x20   : > { %p3201_p8 = pnand %p2523_p7, %p3709_p1  ;;  %s2690_s19 = scalar_lea.vmem %s439_s29, 128 }
  0x21   : > { %p2691_p10 = scmp.ne.s32.totalorder %s439_s29, %s2690_s19  ;;  %p2698_p13 = scmp.lt.s32.totalorder %s439_s29, %s439_s29 }
  0x22   : > { %s3739_s30 = scalar_select %p3201_p8, 1, 0 }
  0x23   : > { %p3207_p9 = pneg %p3201_p8  ;;  %p2699_p0 = scmp.lt.s32.totalorder %s2690_s19, %s2690_s19 }
  0x25   : > { %s3740_s18 = scalar_select %p3207_p9, 1, 0 }
  0x26   : > { %p2693_p11 = pnand %p2691_p10, %p3207_p9  ;;  %p2700_p2 = por %p2699_p0, %p2698_p13 }
  0x28   : > { %p2694_p12 = pneg %p2693_p11 }
  0x2a   : > { %p2701_p3 = pnand %p2700_p2, %p2694_p12 }
  0x2c   : > { %2704 = shalt.err (!%p2701_p3)
}
  0x2d   : > { %s3700_s20 = smov 64   ;;  %s3702_s21 = smov 4  }
  0x2e   : > { %s3741_s3 = sld [smem:[#allocation43_spill]]  ;;  %s2716_s16 = scalar_lea.vmem %s468_s17, 1024 }
  0x2f   : > { %p2717_p7 = scmp.ne.s32.totalorder %s468_s17, %s2716_s16  ;;  %p2724_p13 = scmp.lt.s32.totalorder %s468_s17, %s468_s17 }
  0x30   : > { %p2725_p12 = scmp.lt.s32.totalorder %s2716_s16, %s2716_s16 }
  0x31   : > { %p2719_p10 = pnand %p2717_p7, %p3207_p9 }
  0x32   : > { %p2726_p0 = por %p2725_p12, %p2724_p13 }
  0x33   : > { %p2720_p11 = pneg %p2719_p10 }
  0x34   : > { %2529 = dma.hbm_to_vmem [thread:$0]  (!%p3201_p8), %s3741_s3, 128, %s439_s29, [#allocation9], %s3700_s20, %s3700_s20, %s3702_s21  }
  0x35   : > { %p2727_p2 = pnand %p2726_p0, %p2720_p11 }
  0x37   : > { %2730 = shalt.err (!%p2727_p2)
}
  0x38   : > { %s3742_s6 = sld [smem:[#allocation45_spill]]  ;;  %s3232_s16 = sadd.s32 1, %s3053_s24  }
  0x39   : > { %3743 = sst [smem:[#allocation39_spill]] %s3232_s16  ;;  %s235_s29 = sadd.s32 1, %s3049_s23 }
  0x3a   : > { %s232_s28 = ssub.s32 %s3053_s24, %s3232_s16  ;;  %p242_p3 = scmp.ne.s32.totalorder %s3049_s23, %s3045_s22 }
  0x3b   : > { %p233_p7 = scmp.eq.s32.totalorder %s232_s28, 0  ;;  %p243_p10 = scmp.eq.s32.totalorder %s3053_s24, 0 }
  0x3c   : > { %p2560_p11 = scmp.lt.s32.totalorder %s3053_s24, 2  ;;  %s3704_s19 = sand.u32 1, %s3049_s23  }
  0x3d   : > { %s3243_s0 = scalar_select %p233_p7, %s3049_s23, %s235_s29  }
  0x3e   : > { %2535 = dma.hbm_to_vmem [thread:$0]  (!%p3201_p8), %s3742_s6, 1024, %s468_s17, [#allocation12], %s3700_s20, %s3700_s20, %s3702_s21  }
  0x3f   : > { %3744 = sst [smem:[#allocation40_spill]] %s3243_s0  ;;  %p244_p13 = por %p243_p10, %p242_p3 }
  0x40   : > { %s3247_s3 = sshll.u32 %s3053_s24, 10  ;;  %s3251_s17 = sshll.u32 %s3704_s19, 6 }
  0x41   : > { %s3745_s10 = sld [smem:[#allocation48_spill]]  ;;  %p3259_p12 = pnand %p2560_p11, %p244_p13 }
  0x42   : > { %s504_s28 = scalar_lea.vmem [#allocation14], %s3251_s17  ;;  %s3747_s19 = sand.u32 1, %s3053_s24  }
  0x43   : > { %s511_s9 = sshll.u32 %s504_s28, 4  ;;  %s3268_s0 = scalar_lea.sflag [#allocation15], %s3747_s19  ;;  %s3264_s9 = int_to_ptr.vmem [resolvable:$true] %s511_s9 }
  0x44   : > { %p3274_p2 = pneg %p3259_p12 }
  0x47   : > { %s3257_s6 = scalar_lea.hbm %s3745_s10, %s3247_s3  ;;  %s2736_s28 = scalar_lea.hbm %s3745_s10, 2048 }
  0x48   : > { %s2731_s16 = scalar_lea.hbm %s3257_s6, 1024  ;;  %p2737_p10 = scmp.lt.s32.totalorder %s3257_s6, %s3745_s10 }
  0x49   : > { %p2732_p0 = scmp.ne.s32.totalorder %s3257_s6, %s2731_s16  ;;  %p2738_p11 = scmp.lt.s32.totalorder %s2736_s28, %s2731_s16 }
  0x4b   : > { %p2734_p3 = pnand %p3274_p2, %p2732_p0  ;;  %p2739_p13 = por %p2738_p11, %p2737_p10 }
  0x4d   : > { %p2735_p7 = pneg %p2734_p3 }
  0x4f   : > { %p2740_p4 = pnand %p2739_p13, %p2735_p7 }
  0x51   : > { %2743 = shalt.err (!%p2740_p4)
}
  0x52   : > { %s2744_s19 = scalar_lea.vmem %s3264_s9, 1024  ;;  %s3059_s15 = smov [#allocation14]  }
  0x53   : > { %p2745_p1 = scmp.ne.s32.totalorder %s3264_s9, %s2744_s19  ;;  %s2749_s7 = sshll.u32 %s3059_s15, 4  ;;  %s2750_s7 = int_to_ptr.vmem [resolvable:$false] %s2749_s7 }
  0x54   : > { %s2751_s21 = scalar_lea.vmem %s2750_s7, 2048  ;;  %p2752_p5 = scmp.lt.s32.totalorder %s3264_s9, %s2750_s7 }
  0x55   : > { %p2747_p0 = pnand %p2745_p1, %p3274_p2  ;;  %p2753_p6 = scmp.lt.s32.totalorder %s2751_s21, %s2744_s19 }
  0x57   : > { %p2748_p3 = pneg %p2747_p0  ;;  %p2754_p8 = por %p2753_p6, %p2752_p5 }
  0x59   : > { %p2755_p9 = pnand %p2754_p8, %p2748_p3 }
  0x5b   : > { %2758 = shalt.err (!%p2755_p9)
}
  0x5c   : > { %s3749_s2 = smov 4   ;;  %s3750_s5 = smov 64  }
  0x5d   : > { %2542 = dma.hbm_to_vmem [thread:$0]  (!%p3259_p12), %s3257_s6, 1024, %s3264_s9, %s3268_s0, %s3750_s5, %s3750_s5, %s3749_s2  }
  0x5e   : > { %s3304_s28 = scalar_lea.hbm %s3695_s12, %s3247_s3  ;;  %s546_s19 = scalar_lea.vmem [#allocation17], %s3251_s17 }
  0x5f   : > { %s553_s7 = sshll.u32 %s546_s19, 4  ;;  %s3060_s21 = smov [#allocation5]   ;;  %s3307_s7 = int_to_ptr.vmem [resolvable:$true] %s553_s7 }
  0x60   : > { %s3309_s10 = sshll.u32 %s3060_s21, 4  ;;  %s3751_s26 = sand.u32 1, %s3053_s24   ;;  %s423_s10 = int_to_ptr.vmem [resolvable:$true] %s3309_s10 }
  0x61   : > { %s3313_s22 = scalar_lea.sflag [#allocation18], %s3751_s26  ;;  %s2759_s25 = scalar_lea.hbm %s3304_s28, 1024 }
  0x62   : > { %p2760_p1 = scmp.ne.s32.totalorder %s3304_s28, %s2759_s25  ;;  %s2764_s15 = scalar_lea.hbm %s3695_s12, 2048 }
  0x63   : > { %p2765_p6 = scmp.lt.s32.totalorder %s3304_s28, %s3695_s12  ;;  %p2766_p8 = scmp.lt.s32.totalorder %s2764_s15, %s2759_s25 }
  0x64   : > { %p2762_p4 = pnand %p2760_p1, %p3274_p2 }
  0x65   : > { %p2767_p9 = por %p2766_p8, %p2765_p6 }
  0x66   : > { %p2763_p5 = pneg %p2762_p4 }
  0x68   : > { %p2768_p7 = pnand %p2767_p9, %p2763_p5 }
  0x6a   : > { %2771 = shalt.err (!%p2768_p7)
}
  0x6b   : > { %s2772_s24 = scalar_lea.vmem %s3307_s7, 1024  ;;  %s3061_s26 = smov [#allocation17]  }
  0x6c   : > { %p2773_p10 = scmp.ne.s32.totalorder %s3307_s7, %s2772_s24  ;;  %s2777_s19 = sshll.u32 %s3061_s26, 4  ;;  %s2778_s19 = int_to_ptr.vmem [resolvable:$false] %s2777_s19 }
  0x6d   : > { %s2779_s21 = scalar_lea.vmem %s2778_s19, 2048  ;;  %p2780_p0 = scmp.lt.s32.totalorder %s3307_s7, %s2778_s19 }
  0x6e   : > { %p2775_p11 = pnand %p2773_p10, %p3274_p2  ;;  %p2781_p3 = scmp.lt.s32.totalorder %s2779_s21, %s2772_s24 }
  0x70   : > { %p2776_p13 = pneg %p2775_p11  ;;  %p2782_p1 = por %p2781_p3, %p2780_p0 }
  0x72   : > { %p2783_p4 = pnand %p2782_p1, %p2776_p13 }
  0x74   : > { %2786 = shalt.err (!%p2783_p4)
}
  0x75   : > { %2548 = dma.hbm_to_vmem [thread:$0]  (!%p3259_p12), %s3304_s28, 1024, %s3307_s7, %s3313_s22, %s3750_s5, %s3750_s5, %s3749_s2  }
  0x76   : > { %s2798_s25 = scalar_lea.vmem %s423_s10, 128  ;;  %p3752_p6 = scmp.ne.s32.totalorder %s3740_s18, 0 }
  0x77   : > { %p2799_p5 = scmp.ne.s32.totalorder %s423_s10, %s2798_s25  ;;  %p2806_p7 = scmp.lt.s32.totalorder %s423_s10, %s423_s10 }
  0x78   : > { %p2807_p10 = scmp.lt.s32.totalorder %s2798_s25, %s2798_s25 }
  0x79   : > { %p2801_p8 = pnand %p2799_p5, %p3752_p6 }
  0x7a   : > { %p2808_p11 = por %p2807_p10, %p2806_p7 }
  0x7b   : > { %p2802_p9 = pneg %p2801_p8 }
  0x7d   : > { %p2809_p13 = pnand %p2808_p11, %p2802_p9 }
  0x7f   : > { %2812 = shalt.err (!%p2809_p13)
}
  0x80   : > { %p3753_p0 = scmp.ne.s32.totalorder %s3739_s30, 0  ;;  %s3062_s28 = smov [#allocation10]  }
  0x81   : > { %s451_s7 = sshll.u32 %s3062_s28, 4  ;;  %s3063_s9 = smov [#allocation13]   ;;  %s452_s7 = int_to_ptr.vmem [resolvable:$true] %s451_s7 }
  0x82   : > { %2526 = dma.hbm_to_vmem [thread:$0]  (!%p3753_p0), %s3684_s1, 128, %s423_s10, [#allocation6], %s3750_s5, %s3750_s5, %s3749_s2  }
  0x83   : > { %s483_s15 = sshll.u32 %s3063_s9, 4  ;;  %s2824_s16 = scalar_lea.vmem %s452_s7, 128  ;;  %s484_s15 = int_to_ptr.vmem [resolvable:$true] %s483_s15 }
  0x84   : > { %p2825_p3 = scmp.ne.s32.totalorder %s452_s7, %s2824_s16  ;;  %p2832_p5 = scmp.lt.s32.totalorder %s452_s7, %s452_s7 }
  0x85   : > { %p2833_p8 = scmp.lt.s32.totalorder %s2824_s16, %s2824_s16 }
  0x86   : > { %p2827_p1 = pnand %p2825_p3, %p3752_p6 }
  0x87   : > { %p2834_p9 = por %p2833_p8, %p2832_p5 }
  0x88   : > { %p2828_p4 = pneg %p2827_p1 }
  0x8a   : > { %p2835_p7 = pnand %p2834_p9, %p2828_p4 }
  0x8c   : > { %2838 = shalt.err (!%p2835_p7)
}
  0x8d   : > { %2532 = dma.hbm_to_vmem [thread:$0]  (!%p3753_p0), %s3687_s4, 128, %s452_s7, [#allocation9], %s3750_s5, %s3750_s5, %s3749_s2  }
  0x8e   : > { %s2850_s26 = scalar_lea.vmem %s484_s15, 1024  ;;  %p2858_p3 = scmp.lt.s32.totalorder %s484_s15, %s484_s15 }
  0x8f   : > { %p2851_p10 = scmp.ne.s32.totalorder %s484_s15, %s2850_s26  ;;  %p2859_p1 = scmp.lt.s32.totalorder %s2850_s26, %s2850_s26 }
  0x91   : > { %p2853_p11 = pnand %p2851_p10, %p3752_p6  ;;  %p2860_p4 = por %p2859_p1, %p2858_p3 }
  0x93   : > { %p2854_p13 = pneg %p2853_p11 }
  0x95   : > { %p2861_p5 = pnand %p2860_p4, %p2854_p13 }
  0x97   : > { %2864 = shalt.err (!%p2861_p5)
}
  0x98   : > { %2538 = dma.hbm_to_vmem [thread:$0]  (!%p3753_p0), %s3691_s8, 1024, %s484_s15, [#allocation12], %s3750_s5, %s3750_s5, %s3749_s2  }
  0x99   : > { %s3374_s27 = scalar_lea.hbm %s3694_s11, %s3247_s3  ;;  %s525_s6 = scalar_lea.vmem [#allocation16], %s3251_s17 }
  0x9a   : > { %s532_s30 = sshll.u32 %s525_s6, 4  ;;  %s2865_s28 = scalar_lea.hbm %s3374_s27, 1024  ;;  %s533_s30 = int_to_ptr.vmem [resolvable:$true] %s532_s30 }
  0x9b   : > { %p2866_p6 = scmp.ne.s32.totalorder %s3374_s27, %s2865_s28  ;;  %s2870_s15 = scalar_lea.hbm %s3694_s11, 2048 }
  0x9c   : > { %p2871_p0 = scmp.lt.s32.totalorder %s3374_s27, %s3694_s11  ;;  %p2872_p7 = scmp.lt.s32.totalorder %s2870_s15, %s2865_s28 }
  0x9d   : > { %p2868_p8 = pnand %p2866_p6, %p3274_p2 }
  0x9e   : > { %p2873_p10 = por %p2872_p7, %p2871_p0 }
  0x9f   : > { %p2869_p9 = pneg %p2868_p8 }
  0xa1   : > { %p2874_p11 = pnand %p2873_p10, %p2869_p9 }
  0xa3   : > { %2877 = shalt.err (!%p2874_p11)
}
  0xa4   : > { %s2878_s24 = scalar_lea.vmem %s533_s30, 1024  ;;  %s3064_s26 = smov [#allocation16]  }
  0xa5   : > { %p2879_p13 = scmp.ne.s32.totalorder %s533_s30, %s2878_s24  ;;  %s2883_s19 = sshll.u32 %s3064_s26, 4  ;;  %s2884_s19 = int_to_ptr.vmem [resolvable:$false] %s2883_s19 }
  0xa6   : > { %s2885_s21 = scalar_lea.vmem %s2884_s19, 2048  ;;  %p2886_p4 = scmp.lt.s32.totalorder %s533_s30, %s2884_s19 }
  0xa7   : > { %p2881_p3 = pnand %p2879_p13, %p3274_p2  ;;  %p2887_p5 = scmp.lt.s32.totalorder %s2885_s21, %s2878_s24 }
  0xa9   : > { %p2882_p1 = pneg %p2881_p3  ;;  %p2888_p6 = por %p2887_p5, %p2886_p4 }
  0xab   : > { %p2889_p8 = pnand %p2888_p6, %p2882_p1 }
  0xad   : > { %2892 = shalt.err (!%p2889_p8)
}
  0xae   : > { %2545 = dma.hbm_to_vmem [thread:$0]  (!%p3259_p12), %s3374_s27, 1024, %s533_s30, %s3268_s0, %s3750_s5, %s3750_s5, %s3749_s2  }
  0xaf   : > { %s3401_s6 = scalar_lea.hbm %s3696_s13, %s3247_s3  ;;  %s567_s28 = scalar_lea.vmem [#allocation19], %s3251_s17 }
  0xb0   : > { %s574_s7 = sshll.u32 %s567_s28, 4  ;;  %s2893_s9 = scalar_lea.hbm %s3401_s6, 1024  ;;  %s575_s7 = int_to_ptr.vmem [resolvable:$true] %s574_s7 }
  0xb1   : > { %p2894_p9 = scmp.ne.s32.totalorder %s3401_s6, %s2893_s9  ;;  %s2898_s0 = scalar_lea.hbm %s3696_s13, 2048 }
  0xb2   : > { %p2899_p10 = scmp.lt.s32.totalorder %s3401_s6, %s3696_s13  ;;  %p2900_p11 = scmp.lt.s32.totalorder %s2898_s0, %s2893_s9 }
  0xb3   : > { %p2896_p0 = pnand %p2894_p9, %p3274_p2 }
  0xb4   : > { %p2901_p13 = por %p2900_p11, %p2899_p10 }
  0xb5   : > { %p2897_p7 = pneg %p2896_p0 }
  0xb7   : > { %p2902_p3 = pnand %p2901_p13, %p2897_p7 }
  0xb9   : > { %2905 = shalt.err (!%p2902_p3)
}
  0xba   : > { %s2906_s10 = scalar_lea.vmem %s575_s7, 1024  ;;  %s3065_s24 = smov [#allocation19]  }
  0xbb   : > { %p2907_p1 = scmp.ne.s32.totalorder %s575_s7, %s2906_s10  ;;  %s2911_s26 = sshll.u32 %s3065_s24, 4  ;;  %s2912_s26 = int_to_ptr.vmem [resolvable:$false] %s2911_s26 }
  0xbc   : > { %s2913_s19 = scalar_lea.vmem %s2912_s26, 2048  ;;  %p2914_p6 = scmp.lt.s32.totalorder %s575_s7, %s2912_s26 }
  0xbd   : > { %p2909_p4 = pnand %p2907_p1, %p3274_p2  ;;  %p2915_p8 = scmp.lt.s32.totalorder %s2913_s19, %s2906_s10 }
  0xbf   : > { %p2910_p5 = pneg %p2909_p4  ;;  %p2916_p9 = por %p2915_p8, %p2914_p6 }
  0xc1   : > { %p2917_p0 = pnand %p2916_p9, %p2910_p5 }
  0xc3   : > { %2920 = shalt.err (!%p2917_p0)
}
  0xc4   : > { %2551 = dma.hbm_to_vmem [thread:$0]  (!%p3259_p12), %s3401_s6, 1024, %s575_s7, %s3313_s22, %s3750_s5, %s3750_s5, %s3749_s2  }
  0xc5   : > { %s3428_s25 = scalar_lea.hbm %s3697_s14, %s3247_s3  ;;  %s588_s28 = scalar_lea.vmem [#allocation20], %s3251_s17 }
  0xc6   : > { %s595_s9 = sshll.u32 %s588_s28, 4  ;;  %s3754_s15 = sand.u32 1, %s3049_s23   ;;  %s3431_s9 = int_to_ptr.vmem [resolvable:$true] %s595_s9 }
  0xc7   : > { %s585_s16 = scalar_lea.sflag [#allocation21], %s3754_s15  ;;  %s2921_s0 = scalar_lea.hbm %s3428_s25, 1024 }
  0xc8   : > { %p2922_p7 = scmp.ne.s32.totalorder %s3428_s25, %s2921_s0  ;;  %s2926_s7 = scalar_lea.hbm %s3697_s14, 2048 }
  0xc9   : > { %p2927_p13 = scmp.lt.s32.totalorder %s3428_s25, %s3697_s14  ;;  %p2928_p3 = scmp.lt.s32.totalorder %s2926_s7, %s2921_s0 }
  0xca   : > { %p2924_p10 = pnand %p2922_p7, %p3274_p2 }
  0xcb   : > { %p2929_p1 = por %p2928_p3, %p2927_p13 }
  0xcc   : > { %p2925_p11 = pneg %p2924_p10 }
  0xce   : > { %p2930_p4 = pnand %p2929_p1, %p2925_p11 }
  0xd0   : > { %2933 = shalt.err (!%p2930_p4)
}
  0xd1   : > { %s2934_s17 = scalar_lea.vmem %s3431_s9, 1024  ;;  %s3066_s30 = smov [#allocation20]  }
  0xd2   : > { %p2935_p5 = scmp.ne.s32.totalorder %s3431_s9, %s2934_s17  ;;  %s2939_s10 = sshll.u32 %s3066_s30, 4  ;;  %s2940_s10 = int_to_ptr.vmem [resolvable:$false] %s2939_s10 }
  0xd3   : > { %s2941_s24 = scalar_lea.vmem %s2940_s10, 2048  ;;  %p2942_p9 = scmp.lt.s32.totalorder %s3431_s9, %s2940_s10 }
  0xd4   : > { %p2937_p6 = pnand %p2935_p5, %p3274_p2  ;;  %p2943_p0 = scmp.lt.s32.totalorder %s2941_s24, %s2934_s17 }
  0xd6   : > { %p2938_p8 = pneg %p2937_p6  ;;  %p2944_p7 = por %p2943_p0, %p2942_p9 }
  0xd8   : > { %p2945_p10 = pnand %p2944_p7, %p2938_p8 }
  0xda   : > { %2948 = shalt.err (!%p2945_p10)
}
  0xdb   : > { %2554 = dma.hbm_to_vmem [thread:$0]  (!%p3259_p12), %s3428_s25, 1024, %s3431_s9, %s585_s16, %s3750_s5, %s3750_s5, %s3749_s2  }
  0xdc   : > { %s3755_s20 = sld [smem:[#allocation38_spill]] }
  0xe2   : > { %p3756_p2 = scmp.ne.s32.totalorder %s3755_s20, 0 }
  0xe3   : > { %s3757_s26 = sld [smem:[#allocation36_spill]] (!%p3756_p2) }
  0xe4   : > { %614 = sbr.rel (%p3756_p2) target bundleno = 2202 (0x89a), region = 80 }
  0xe9   : > { %p3758_p11 = scmp.eq.s32.totalorder %s3757_s26, 0 }
  0xeb   : > { %3010 = dma.done.wait (%p3758_p11), [#allocation6], 128   ;;  %p3759_p13 = pmov %p3758_p11 }
  0xec   : > { %p3760_p3 = pmov %p3758_p11 }
  0xed   : > { %3012 = vsyncadd (%p3759_p13), [#allocation6], 4294967168 }
  0xee   : > { %3014 = dma.done.wait (%p3760_p3), [#allocation9], 256   ;;  %p3761_p1 = pmov %p3760_p3 }
  0xf0   : > { %3016 = vsyncadd (%p3761_p1), [#allocation9], 4294967040  ;;  %p3762_p4 = pmov %p3761_p1 }
  0xf1   : > { %p3763_p12 = pmov %p3761_p1 }
  0xf2   : > { %3018 = dma.done.wait (%p3762_p4), [#allocation12], 2048  }
  0xf3   : > { %3020 = vsyncadd (%p3763_p12), [#allocation12], 4294965248  ;;  %s3764_s29 = sld [smem:[#allocation35_spill]]  ;;  %s636_s5 = sand.u32 1, %s3757_s26  }
  0xf4   : > { %s3765_s2 = sld [smem:[#allocation37_spill]]  ;;  %s637_s18 = scalar_lea.sflag [#allocation15], %s636_s5 }
  0xf9   : > { %s638_s19 = sand.u32 1, %s3764_s29  }
  0xfa   : > { %s2139_s21 = sshll.u32 %s638_s19, 6  ;;  %p3766_p5 = scmp.ne.s32.totalorder %s3765_s2, 0 }
  0xfb   : > { %s3474_s25 = scalar_lea.vmem [#allocation14], %s2139_s21 }
  0xfc   : > { %3022 = dma.done.wait (%p3766_p5), %s637_s18, 2048  }
  0xfd   : > { %3024 = vsyncadd (%p3766_p5), %s637_s18, 4294965248  ;;  %s3480_s28 = scalar_lea.vmem [#allocation16], %s2139_s21  ;;  %s655_s9 = scalar_lea.sflag [#allocation18], %s636_s5 }
  0xfe   : > { %s3482_s15 = scalar_lea.vmem [#allocation17], %s2139_s21 }
  0xff   : > { %3026 = dma.done.wait (%p3766_p5), %s655_s9, 2048  }
 0x100   : > { %3028 = vsyncadd (%p3766_p5), %s655_s9, 4294965248  ;;  %s3488_s16 = scalar_lea.vmem [#allocation19], %s2139_s21  ;;  %s673_s0 = scalar_lea.sflag [#allocation21], %s638_s19 }
 0x101   : > { %s3490_s22 = scalar_lea.vmem [#allocation20], %s2139_s21 }
 0x102   : > { %3030 = dma.done.wait (%p3766_p5), %s673_s0, 1024  }
 0x103   : > { %3032 = vsyncadd (%p3766_p5), %s673_s0, 4294966272  ;;  %p742_p6 = scmp.lt.s32.totalorder %s3757_s26, 1  ;;  %s3767_s17 = sld [smem:[#allocation49_spill]] }
 0x104   : > { %p3768_p8 = scmp.ne.s32.totalorder %s3757_s26, 0 }
 0x105   : > { %s743_s6 = scalar_select %p742_p6, %s3757_s26, 1 }
 0x106   : > { %750 = sbr.rel (%p3768_p8) target bundleno = 283 (0x11b), region = 124  ;;  %s3067_s10 = smov (!%p3768_p8), [#allocation2]  }
 0x107   : > { %s2144_s7 = sshll.u32 %s743_s6, 3  ;;  %s758_s24 = sshll.u32 (!%p3768_p8), %s3067_s10, 4  ;;  %s759_s24 = int_to_ptr.vmem [resolvable:$true] %s758_s24 }
 0x108   : > { %s2957_s20 = scalar_lea.vmem (!%p3768_p8), %s759_s24, 128  ;;  %p2962_p0 = scmp.lt.s32.totalorder (!%p3768_p8), %s759_s24, %s759_s24 }
 0x109   : > { %s3501_s30 = scalar_lea.vmem %s3767_s17, %s2144_s7  ;;  %p2958_p9 = scmp.ne.s32.totalorder (!%p3768_p8), %s759_s24, %s2957_s20 }
 0x10a   : > { %p2963_p7 = scmp.lt.s32.totalorder (!%p3768_p8), %s2957_s20, %s2957_s20 }
 0x10c   : > { %p2964_p10 = por %p2963_p7, %p2962_p0 }
 0x10e   : > { %p2965_p2 = pnand %p2964_p10, %p2958_p9 }
 0x110   : > { %2968 = shalt.err (!%p2965_p2)  }
 0x111   : > { %s3769_s5 = sld [smem:[#allocation41_spill]] }
 0x117   : > { %761 = dma.hbm_to_vmem [thread:$0]  %s3769_s5, 128, %s759_s24, [#allocation4] }
 0x118   : > { %3033 = dma.done.wait [#allocation4], 128 }
 0x119   : > { %3034 = vsyncadd [#allocation4], 4294967168  ;;  %v3068_v0 = vmov 0.0  }
 0x11a   : > { %766 = vst [vmem:[#allocation3] sm:$0xff] %v3068_v0  ;;  %767 = vst [vmem:[#allocation3 + $0x8] sm:$0xff] %v3068_v0 }
 0x11b PF: > { %v3069_v3 = vmov 0.0   ;;  %vm3070_vm0 = vmmov 0   ;;  %v3513_v5 = vld [vmem:[#allocation8] sm:$0xff]   ;;  %v2617_v6 = vld [vmem:[%s3474_s25 + $0x38] sm:$0xff]   ;;  %vm778_vm1 = vcmask 130048   ;;  %v2619_v8 = vld [vmem:[%s3474_s25 + $0x28] sm:$0xff]  }
 0x11c   : > { %2317 = vmatprep.subr.bf16.mxu0 %v3069_v3  ;;  %2319 = vmatprep.mubr.msk.bf16.mxu0 %vm3070_vm0, %v3069_v3  ;;  %v2618_v7 = vld [vmem:[%s3474_s25 + $0x30] sm:$0xff]   ;;  %v2620_v9 = vld [vmem:[%s3474_s25 + $0x20] sm:$0xff]   ;;  %v2621_v10 = vld [vmem:[%s3474_s25 + $0x18] sm:$0xff]   ;;  %s3770_s21 = sld [smem:[#allocation44_spill]]  ;;  %vm1042_vm2 = vcmask 261120  }
 0x11d   : > { %2323 = vmatprep.subr.bf16.mxu1 %v2617_v6  ;;  %v2622_v11 = vld [vmem:[%s3474_s25 + $0x10] sm:$0xff]   ;;  %v2623_v12 = vld [vmem:[%s3474_s25 + $0x8] sm:$0xff]   ;;  %v2624_v13 = vld [vmem:[%s3474_s25] sm:$0xff]   ;;  %s3772_s25 = sld [smem:[#allocation42_spill]] }
 0x11e   : > { %2324 = vmatpush3.bf16.msra.mxu1 %v2617_v6  ;;  %v2233_v17 = vld [vmem:[#allocation2] sm:$0xff]   ;;  %v2632_v28 = vld [vmem:[%s3482_s15 + $0x38] sm:$0xff]   ;;  %v2636_v30 = vld [vmem:[%s3482_s15 + $0x28] sm:$0xff]  }
 0x11f   : > { %2325 = vmatprep.subr.bf16.mxu1 %v2618_v7  ;;  %v2234_v19 = vunpack.c.l.bf16 %v2233_v17  ;;  %v2235_v20 = vunpack.c.h.bf16 %v2233_v17  ;;  %v2634_v29 = vld [vmem:[%s3482_s15 + $0x30] sm:$0xff]   ;;  %v2638_v31 = vld [vmem:[%s3482_s15 + $0x20] sm:$0xff]   ;;  %v2640_v32 = vld [vmem:[%s3482_s15 + $0x18] sm:$0xff]  }
 0x120   : > { %v2629_v51 = vld [vmem:[#allocation5] sm:$0xff]   ;;  %v2630_v52 = vld [vmem:[%s3480_s28 + $0x38] sm:$0xff]   ;;  %v2631_v53 = vld [vmem:[%s3480_s28 + $0x30] sm:$0xff]  }
 0x121   : > { %v768_v1 = vld [vmem:[#allocation3] sm:$0xff]  ;;  %v769_v2 = vld [vmem:[#allocation3 + $0x8] sm:$0xff]  ;;  %v2633_v54 = vld [vmem:[%s3480_s28 + $0x28] sm:$0xff]  }
 0x122   : > { %v3509_v4 = vpack.c.bf16 %v769_v2, %v768_v1  ;;  %2326 = vmatpush3.bf16.msra.mxu1 %v2618_v7  ;;  %s3771_s18 = smov %s3770_s21  ;;  %v2625_v14 = vld [vmem:[%s3770_s21] sm:$0xff]   ;;  %v2635_v55 = vld [vmem:[%s3480_s28 + $0x20] sm:$0xff]   ;;  %v2637_v56 = vld [vmem:[%s3480_s28 + $0x18] sm:$0xff]  }
 0x123   : > { %2327 = vmatprep.subr.bf16.mxu1 %v2619_v8  ;;  %v2626_v15 = vld [vmem:[%s3771_s18 + $0x8] sm:$0xff]   ;;  %2339 = vmatprep.mubr.bf16.mxu1 %v2625_v14  ;;  %v2627_v16 = vld [vmem:[%s3772_s25] sm:$0xff]   ;;  %v2641_v58 = vld [vmem:[%s3480_s28 + $0x8] sm:$0xff]  }
 0x124   : > { %2318 = vmatpush3.bf16.msra.mxu0 %v3509_v4  ;;  %v2628_v27 = vld [vmem:[%s3772_s25 + $0x8] sm:$0xff]   ;;  %v2639_v57 = vld [vmem:[%s3480_s28 + $0x10] sm:$0xff]   ;;  %v2643_v60 = vld [vmem:[%s3480_s28] sm:$0xff]   ;;  %s3773_s28 = sld [smem:[#allocation36_spill]] }
 0x125   : > { %v2642_v59 = vld [vmem:[%s3482_s15 + $0x10] sm:$0xff]   ;;  %v2644_v61 = vld [vmem:[%s3482_s15 + $0x8] sm:$0xff]   ;;  %v2645_v62 = vld [vmem:[%s3482_s15] sm:$0xff]  }
 0x126   : > { %2328 = vmatpush3.bf16.msra.mxu1 %v2619_v8  ;;  %v2646_v8 = vld [vmem:[%s3488_s16 + $0x38] sm:$0xff]   ;;  %v2652_v14 = vld [vmem:[%s3488_s16 + $0x8] sm:$0xff]   ;;  %v2653_v17 = vld [vmem:[%s3488_s16] sm:$0xff]  }
 0x127   : > { %2320 = vmatmul.mubr.msk.bf16.vlgmr.msra.gmra.mxu0 %vm778_vm1, %v3513_v5  ;;  %2329 = vmatprep.subr.bf16.mxu1 %v2620_v9 }
 0x128   : > { %2345 = vmatprep.mubr.msk.bf16.mxu0 %vm778_vm1, %v2627_v16 }
 0x12a   : > { %2330 = vmatpush3.bf16.msra.mxu1 %v2620_v9  ;;  %p2201_p11 = scmp.ne.s32.totalorder %s3773_s28, 1 }
 0x12b   : > { %2331 = vmatprep.subr.bf16.mxu1 %v2621_v10  ;;  %s3775_s10 = sld [smem:[#allocation47_spill]] (!%p2201_p11) }
 0x12e   : > { %2332 = vmatpush3.bf16.msra.mxu1 %v2621_v10  ;;  %v2648_v10 = vld [vmem:[%s3488_s16 + $0x28] sm:$0xff]  }
 0x12f   : > { %2333 = vmatprep.subr.bf16.mxu1 %v2622_v11 }
 0x132   : > { %2334 = vmatpush3.bf16.msra.mxu1 %v2622_v11  ;;  %v2649_v11 = vld [vmem:[%s3488_s16 + $0x20] sm:$0xff]  }
 0x133   : > { %2335 = vmatprep.subr.bf16.mxu1 %v2623_v12 }
 0x136   : > { %2336 = vmatpush3.bf16.msra.mxu1 %v2623_v12  ;;  %v2650_v12 = vld [vmem:[%s3488_s16 + $0x18] sm:$0xff]  }
 0x137   : > { %2337 = vmatprep.subr.bf16.mxu1 %v2624_v13 }
 0x13a   : > { %2338 = vmatpush3.bf16.msra.mxu1 %v2624_v13  ;;  %v2651_v13 = vld [vmem:[%s3488_s16 + $0x10] sm:$0xff]  }
 0x13b   : > { %2377 = vmatprep.subr.bf16.mxu1 %v3069_v3 }
 0x13d   : > { %2340 = vmatmul.mubr.bf16.vlgmr.msra.gmra.mxu1 %v2626_v15 }
 0x13e   : > { %2393 = vmatprep.mubr.msk.bf16.mxu1 %vm3070_vm0, %v3069_v3  ;;  %2378 = vmatpush3.bf16.msra.mxu1 %v2632_v28 }
 0x13f   : > { %2379 = vmatprep.subr.bf16.mxu1 %v3069_v3 }
 0x142   : > { %2380 = vmatpush3.bf16.msra.mxu1 %v2634_v29 }
 0x143   : > { %2381 = vmatprep.subr.bf16.mxu1 %v3069_v3 }
 0x146   : > { %2382 = vmatpush3.bf16.msra.mxu1 %v2636_v30 }
 0x147   : > { %2383 = vmatprep.subr.bf16.mxu1 %v3069_v3 }
 0x14a   : > { %2384 = vmatpush3.bf16.msra.mxu1 %v2638_v31 }
 0x14b   : > { %2385 = vmatprep.subr.bf16.mxu1 %v3069_v3 }
 0x14e   : > { %2386 = vmatpush3.bf16.msra.mxu1 %v2640_v32 }
 0x14f   : > { %2387 = vmatprep.subr.bf16.mxu1 %v3069_v3 }
 0x152   : > { %2388 = vmatpush3.bf16.msra.mxu1 %v2642_v59 }
 0x153   : > { %2389 = vmatprep.subr.bf16.mxu1 %v3069_v3 }
 0x156   : > { %2390 = vmatpush3.bf16.msra.mxu1 %v2644_v61 }
 0x157   : > { %2391 = vmatprep.subr.bf16.mxu1 %v3069_v3 }
 0x15a   : > { %2392 = vmatpush3.bf16.msra.mxu1 %v2645_v62 }
 0x15b   : > { %2429 = vmatprep.subr.bf16.mxu1 %v3069_v3 }
 0x15d   : > { %2394 = vmatmul.mubr.bf16.vlgmr.msra.gmra.mxu1 %v3509_v4  ;;  %v2647_v4 = vld [vmem:[%s3488_s16 + $0x30] sm:$0xff]  }
 0x15e   : > { %2445 = vmatprep.mubr.msk.bf16.mxu1 %vm3070_vm0, %v3069_v3 }
 0x1e7   : > { %v816_v18 = vpop.f32.mrf.mxu0 }
 0x1e8   : > { %v3539_v23 = vadd.f32 %v2234_v19, %v816_v18 }
 0x1e9   : > { %v2321_v21 = vpop.f32.mrf.mxu0 }
 0x1ea   : > { %v1195_v21 = vlaneseq }
 0x1eb   : > { %v819_v22 = vpop.f32.mrf.mxu0 }
 0x1ec   : > { %v3541_v24 = vadd.f32 %v2235_v20, %v819_v22  ;;  %v3611_v22 = vshrl.u32 %v1195_v21, 7 }
 0x1ed   : > { %v2322_v25 = vpop.f32.mrf.mxu0 }
 0x1ee   : > { %v963_v26 = vpack.c.bf16 %v3541_v24, %v3539_v23 }
 0x1f0   : > { %2343 = vmatprep.subr.bf16.mxu0 %v963_v26 }
 0x1f1   : > { %2344 = vmatpush3.bf16.msra.mxu0 %v963_v26  ;;  %v1203_v26 = vsub.s32 1, %v3611_v22 }
 0x1f2   : > { %2349 = vmatprep.subr.bf16.mxu0 %v3069_v3 }
 0x1f4   : > { %2346 = vmatmul.mubr.msk.bf16.vlgmr.msra.gmra.mxu0 %vm778_vm1, %v2628_v27 }
 0x1f5   : > { %2353 = vmatprep.mubr.msk.bf16.mxu0 %vm3070_vm0, %v3069_v3 }
 0x1fd   : > { %v2341_v33 = vpop.f32.mrf.mxu1 }
 0x1ff   : > { %v943_v34 = vpop.f32.mrf.mxu1 }
 0x201   : > { %v2342_v36 = vpop.f32.mrf.mxu1 }
 0x203   : > { %v946_v41 = vpop.f32.mrf.mxu1 }
 0x21d   : > { %v1307_v15 = vpop.f32.mrf.mxu1 }
 0x21f   : > { %v2395_v16 = vpop.f32.mrf.mxu1 }
 0x221   : > { %v1310_v18 = vpop.f32.mrf.mxu1 }
 0x222   : > { %v1314_v20 = vpack.c.bf16 %v1310_v18, %v1307_v15 }
 0x223   : > { %v2396_v19 = vpop.f32.mrf.mxu1 }
 0x2b4   : > { %v2347_v35 = vpop.f32.mrf.mxu0 }
 0x2b5   : > { %v1023_v38 = vadd.f32 %v2347_v35, %v2341_v33 }
 0x2b6   : > { %v1014_v37 = vpop.f32.mrf.mxu0 }
 0x2b7   : > { %v1031_v43 = vmax.f32 %v1023_v38, 0.0  ;;  %v1015_v44 = vadd.f32 %v1014_v37, %v943_v34 }
 0x2b8   : > { %v2348_v39 = vpop.f32.mrf.mxu0 }
 0x2b9   : > { %v1026_v40 = vadd.f32 %v2348_v39, %v2342_v36  ;;  %v1029_v49 = vmax.f32 %v1015_v44, 0.0  ;;  %v2655_v39 = vld [vmem:[%s3490_s22 + $0x38] sm:$0xff]  }
 0x2ba   : > { %v1017_v42 = vpop.f32.mrf.mxu0  ;;  %2430 = vmatpush3.bf16.msra.mxu1 %v2655_v39 }
 0x2bb   : > { %v1032_v45 = vmax.f32 %v1026_v40, 0.0  ;;  %v1018_v46 = vadd.f32 %v1017_v42, %v946_v41  ;;  %v2656_v40 = vld [vmem:[%s3490_s22 + $0x30] sm:$0xff]   ;;  %2431 = vmatprep.subr.bf16.mxu1 %v3069_v3  ;;  %v2657_v41 = vld [vmem:[%s3490_s22 + $0x28] sm:$0xff]   ;;  %v2658_v42 = vld [vmem:[%s3490_s22 + $0x20] sm:$0xff]  }
 0x2bd   : > { %v1034_v47 = vpack.c.bf16 %v1032_v45, %v1031_v43  ;;  %v1030_v48 = vmax.f32 %v1018_v46, 0.0  ;;  %v2659_v43 = vld [vmem:[%s3490_s22 + $0x18] sm:$0xff]   ;;  %v1464_v46 = vsub.s32 2, %v3611_v22 }
 0x2be   : > { %2432 = vmatpush3.bf16.msra.mxu1 %v2656_v40 }
 0x2bf   : > { %2350 = vmatpush3.bf16.msra.mxu0 %v1034_v47  ;;  %v1033_v50 = vpack.c.bf16 %v1030_v48, %v1029_v49  ;;  %2433 = vmatprep.subr.bf16.mxu1 %v3069_v3 }
 0x2c0   : > { %2351 = vmatprep.subr.bf16.mxu0 %v3069_v3 }
 0x2c2   : > { %2434 = vmatpush3.bf16.msra.mxu1 %v2657_v41 }
 0x2c3   : > { %2352 = vmatpush3.bf16.msra.mxu0 %v1033_v50  ;;  %2435 = vmatprep.subr.bf16.mxu1 %v3069_v3  ;;  %v1470_v50 = vsub.s32 3, %v3611_v22 }
 0x2c4   : > { %2357 = vmatprep.subr.bf16.mxu0 %v3069_v3 }
 0x2c6   : > { %2354 = vmatmul.mubr.msk.bf16.vlgmr.msra.gmra.mxu0 %vm1042_vm2, %v2629_v51  ;;  %2436 = vmatpush3.bf16.msra.mxu1 %v2658_v42 }
 0x2c7   : > { %2358 = vmatpush3.bf16.msra.mxu0 %v2630_v52  ;;  %2373 = vmatprep.mubr.msk.bf16.mxu0 %vm3070_vm0, %v3069_v3 }
 0x2c8   : > { %2359 = vmatprep.subr.bf16.mxu0 %v3069_v3  ;;  %2437 = vmatprep.subr.bf16.mxu1 %v3069_v3 }
 0x2ca   : > { %2438 = vmatpush3.bf16.msra.mxu1 %v2659_v43 }
 0x2cb   : > { %2360 = vmatpush3.bf16.msra.mxu0 %v2631_v53  ;;  %2439 = vmatprep.subr.bf16.mxu1 %v3069_v3 }
 0x2cc   : > { %2361 = vmatprep.subr.bf16.mxu0 %v3069_v3 }
 0x2cf   : > { %2362 = vmatpush3.bf16.msra.mxu0 %v2633_v54 }
 0x2d0   : > { %2363 = vmatprep.subr.bf16.mxu0 %v3069_v3 }
 0x2d3   : > { %2364 = vmatpush3.bf16.msra.mxu0 %v2635_v55 }
 0x2d4   : > { %2365 = vmatprep.subr.bf16.mxu0 %v3069_v3 }
 0x2d7   : > { %2366 = vmatpush3.bf16.msra.mxu0 %v2637_v56 }
 0x2d8   : > { %2367 = vmatprep.subr.bf16.mxu0 %v3069_v3 }
 0x2db   : > { %2368 = vmatpush3.bf16.msra.mxu0 %v2639_v57 }
 0x2dc   : > { %2369 = vmatprep.subr.bf16.mxu0 %v3069_v3 }
 0x2df   : > { %2370 = vmatpush3.bf16.msra.mxu0 %v2641_v58 }
 0x2e0   : > { %2371 = vmatprep.subr.bf16.mxu0 %v3069_v3 }
 0x2e3   : > { %2372 = vmatpush3.bf16.msra.mxu0 %v2643_v60 }
 0x2e4   : > { %2397 = vmatprep.subr.bf16.mxu0 %v3069_v3 }
 0x386   : > { %v1080_v63 = vpop.f32.mrf.mxu0 }
 0x387   : > { %v1087_v2 = vadd.f32 %v1080_v63, %v3539_v23  ;;  %v1197_v23 = vsub.s32 0, %v3611_v22 }
 0x388   : > { %v2355_v0 = vpop.f32.mrf.mxu0 }
 0x38a   : > { %v1083_v1 = vpop.f32.mrf.mxu0 }
 0x38b   : > { %v1088_v6 = vadd.f32 %v1083_v1, %v3541_v24  ;;  %v3615_v24 = vld [vmem:[%s3501_s30] sm:$0xff]  ;;  %v2654_v1 = vld [vmem:[#allocation10] sm:$0xff]  }
 0x38c   : > { %v2356_v7 = vpop.f32.mrf.mxu0  ;;  %v1198_v25 = vrot.slane %v3615_v24, %v1197_v23  ;;  %v1204_v29 = vrot.slane %v3615_v24, %v1203_v26  ;;  %v1465_v49 = vrot.slane %v3615_v24, %v1464_v46  ;;  %v1471_v55 = vrot.slane %v3615_v24, %v1470_v50 }
 0x38d   : > { %v1089_v9 = vpack.c.bf16 %v1088_v6, %v1087_v2  ;;  %v2661_v2 = vld [vmem:[%s3490_s22 + $0x8] sm:$0xff]   ;;  %v2662_v6 = vld [vmem:[%s3490_s22] sm:$0xff]  }
 0x38f   : > { %2374 = vmatmul.mubr.bf16.vlgmr.msra.gmra.mxu0 %v1089_v9 }
 0x390   : > { %2398 = vmatpush3.bf16.msra.mxu0 %v2646_v8  ;;  %2413 = vmatprep.mubr.msk.bf16.mxu0 %vm3070_vm0, %v3069_v3 }
 0x391   : > { %2399 = vmatprep.subr.bf16.mxu0 %v3069_v3 }
 0x394   : > { %2400 = vmatpush3.bf16.msra.mxu0 %v2647_v4 }
 0x395   : > { %2401 = vmatprep.subr.bf16.mxu0 %v3069_v3 }
 0x398   : > { %2402 = vmatpush3.bf16.msra.mxu0 %v2648_v10 }
 0x399   : > { %2403 = vmatprep.subr.bf16.mxu0 %v3069_v3 }
 0x39c   : > { %2404 = vmatpush3.bf16.msra.mxu0 %v2649_v11  ;;  %v1636_v11 = vsub.s32 4, %v3611_v22 }
 0x39d   : > { %2405 = vmatprep.subr.bf16.mxu0 %v3069_v3 }
 0x3a0   : > { %2406 = vmatpush3.bf16.msra.mxu0 %v2650_v12  ;;  %v1642_v12 = vsub.s32 5, %v3611_v22 }
 0x3a1   : > { %2407 = vmatprep.subr.bf16.mxu0 %v3069_v3 }
 0x3a4   : > { %2408 = vmatpush3.bf16.msra.mxu0 %v2651_v13  ;;  %v1637_v13 = vrot.slane %v3615_v24, %v1636_v11 }
 0x3a5   : > { %2409 = vmatprep.subr.bf16.mxu0 %v3069_v3 }
 0x3a8   : > { %2410 = vmatpush3.bf16.msra.mxu0 %v2652_v14  ;;  %v1643_v14 = vrot.slane %v3615_v24, %v1642_v12 }
 0x3a9   : > { %2411 = vmatprep.subr.bf16.mxu0 %v3069_v3 }
 0x3ac   : > { %2412 = vmatpush3.bf16.msra.mxu0 %v2653_v17 }
 0x3ad   : > { %2417 = vmatprep.subr.bf16.mxu0 %v3069_v3 }
 0x44f   : > { %v1188_v27 = vpop.f32.mrf.mxu0 }
 0x450   : > { %v1199_v28 = vmul.f32 %v1198_v25, %v1188_v27 }
 0x451   : > { %v2375_v30 = vpop.f32.mrf.mxu0 }
 0x452   : > { %v1205_v32 = vadd.f32 %v1204_v29, %v1199_v28 }
 0x453   : > { %v1191_v31 = vpop.f32.mrf.mxu0 }
 0x454   : > { %v1200_v33 = vmul.f32 %v1198_v25, %v1191_v31  ;;  %v1207_v36 = vmax.f32 %v1205_v32, 0.0 }
 0x455   : > { %v2376_v34 = vpop.f32.mrf.mxu0 }
 0x456   : > { %v1206_v35 = vadd.f32 %v1204_v29, %v1200_v33 }
 0x458   : > { %v1208_v37 = vmax.f32 %v1206_v35, 0.0 }
 0x45a   : > { %v1315_v38 = vpack.c.bf16 %v1208_v37, %v1207_v36 }
 0x45c   : > { %2240 = vst [vmem:[#allocation2] sm:$0xff] %v1315_v38   ;;  %2414 = vmatmul.mubr.bf16.vlgmr.msra.gmra.mxu0 %v1315_v38 }
 0x45d   : > { %2418 = vmatpush3.bf16.msra.mxu0 %v1314_v20  ;;  %2419 = vmatprep.mubr.msk.bf16.mxu0 %vm3070_vm0, %v3069_v3 }
 0x45e   : > { %2423 = vmatprep.subr.bf16.mxu0 %v3069_v3 }
 0x464   : > { %2420 = vmatmul.mubr.msk.bf16.vlgmr.msra.gmra.mxu0 %vm778_vm1, %v3513_v5  ;;  %v2660_v5 = vld [vmem:[%s3490_s22 + $0x10] sm:$0xff]   ;;  %s3774_s22 = sld [smem:[#allocation46_spill]] (!%p2201_p11) }
 0x465   : > { %2425 = vmatprep.mubr.msk.bf16.mxu0 %vm3070_vm0, %v3069_v3  ;;  %2440 = vmatpush3.bf16.msra.mxu1 %v2660_v5 }
 0x466   : > { %2441 = vmatprep.subr.bf16.mxu1 %v3069_v3 }
 0x469   : > { %2442 = vmatpush3.bf16.msra.mxu1 %v2661_v2 }
 0x46a   : > { %2443 = vmatprep.subr.bf16.mxu1 %v3069_v3 }
 0x46d   : > { %2444 = vmatpush3.bf16.msra.mxu1 %v2662_v6 }
 0x51c   : > { %v1414_v44 = vpop.f32.mrf.mxu0 }
 0x51e   : > { %v2415_v45 = vpop.f32.mrf.mxu0 }
 0x520   : > { %v1417_v47 = vpop.f32.mrf.mxu0 }
 0x522   : > { %v2416_v48 = vpop.f32.mrf.mxu0 }
 0x524   : > { %v1455_v51 = vpop.f32.mrf.mxu0 }
 0x525   : > { %v1456_v52 = vadd.f32 %v1455_v51, %v1414_v44 }
 0x526   : > { %v2421_v53 = vpop.f32.mrf.mxu0 }
 0x527   : > { %v1466_v54 = vmul.f32 %v1465_v49, %v1456_v52 }
 0x528   : > { %v1458_v56 = vpop.f32.mrf.mxu0 }
 0x529   : > { %v1459_v57 = vadd.f32 %v1458_v56, %v1417_v47  ;;  %v1472_v59 = vadd.f32 %v1471_v55, %v1466_v54 }
 0x52a   : > { %v2422_v58 = vpop.f32.mrf.mxu0 }
 0x52b   : > { %v1467_v60 = vmul.f32 %v1465_v49, %v1459_v57  ;;  %v1474_v62 = vmax.f32 %v1472_v59, 0.0 }
 0x52d   : > { %v1473_v61 = vadd.f32 %v1471_v55, %v1467_v60 }
 0x52f   : > { %v1475_v63 = vmax.f32 %v1473_v61, 0.0 }
 0x531   : > { %v1478_v0 = vpack.c.bf16 %v1475_v63, %v1474_v62 }
 0x533   : > { %2424 = vmatpush3.bf16.msra.mxu0 %v1478_v0 }
 0x536   : > { %2426 = vmatmul.mubr.msk.bf16.vlgmr.msra.gmra.mxu0 %vm778_vm1, %v2654_v1 }
 0x5f6   : > { %v1521_v7 = vpop.f32.mrf.mxu0 }
 0x5f8   : > { %v2427_v8 = vpop.f32.mrf.mxu0 }
 0x5fa   : > { %v1524_v9 = vpop.f32.mrf.mxu0 }
 0x5fb   : > { %v1528_v4 = vpack.c.bf16 %v1524_v9, %v1521_v7 }
 0x5fc   : > { %v2428_v10 = vpop.f32.mrf.mxu0 }
 0x5fd   : > { %2446 = vmatmul.mubr.bf16.vlgmr.msra.gmra.mxu1 %v1528_v4 }
 0x6bd   : > { %v1627_v15 = vpop.f32.mrf.mxu1 }
 0x6be   : > { %v1638_v16 = vmul.f32 %v1637_v13, %v1627_v15 }
 0x6bf   : > { %v2447_v17 = vpop.f32.mrf.mxu1 }
 0x6c0   : > { %v1644_v3 = vadd.f32 %v1643_v14, %v1638_v16 }
 0x6c1   : > { %v1630_v18 = vpop.f32.mrf.mxu1 }
 0x6c2   : > { %v1646_v19 = vmax.f32 %v1644_v3, 0.0  ;;  %v1639_v20 = vmul.f32 %v1637_v13, %v1630_v18 }
 0x6c3   : > { %v2448_v21 = vpop.f32.mrf.mxu1 }
 0x6c4   : > { %1657 = vst [vmem:[#allocation3] sm:$0xff] %v1646_v19  ;;  %v1645_v23 = vadd.f32 %v1643_v14, %v1639_v20  ;;  %1662 = sbr.rel (%p2201_p11) target bundleno = 2177 (0x881), region = 132 }
 0x6c6   : > { %v1647_v25 = vmax.f32 %v1645_v23, 0.0 }
 0x6c8   : > { %1658 = vst [vmem:[#allocation3 + $0x8] sm:$0xff] %v1647_v25 }
 0x6c9   : > { %v2663_v22 = vld [vmem:[#allocation11 + $0x38] sm:$0xff]   ;;  %v3071_v26 = vmov 0.0   ;;  %v2664_v24 = vld [vmem:[#allocation11 + $0x30] sm:$0xff]   ;;  %vm3072_vm3 = vmmov 0   ;;  %v2665_v27 = vld [vmem:[#allocation11 + $0x28] sm:$0xff]   ;;  %v1663_v38 = vpack.c.bf16 %v1647_v25, %v1646_v19 }
 0x6ca   : > { %2449 = vmatprep.subr.bf16.mxu0 %v3071_v26  ;;  %2469 = vmatprep.subr.bf16.mxu1 %v3071_v26  ;;  %v2671_v28 = vld [vmem:[#allocation13 + $0x38] sm:$0xff]   ;;  %v2666_v29 = vld [vmem:[#allocation11 + $0x20] sm:$0xff]   ;;  %v2672_v30 = vld [vmem:[#allocation13 + $0x30] sm:$0xff]  }
 0x6cb   : > { %2450 = vmatpush3.bf16.msra.mxu0 %v2663_v22  ;;  %2465 = vmatprep.mubr.msk.bf16.mxu0 %vm3072_vm3, %v3071_v26  ;;  %v2667_v31 = vld [vmem:[#allocation11 + $0x18] sm:$0xff]   ;;  %v2673_v32 = vld [vmem:[#allocation13 + $0x28] sm:$0xff]   ;;  %v2668_v33 = vld [vmem:[#allocation11 + $0x10] sm:$0xff]  }
 0x6cc   : > { %2451 = vmatprep.subr.bf16.mxu0 %v3071_v26  ;;  %2485 = vmatprep.mubr.msk.bf16.mxu1 %vm3072_vm3, %v3071_v26  ;;  %v2674_v34 = vld [vmem:[#allocation13 + $0x20] sm:$0xff]   ;;  %v2669_v35 = vld [vmem:[#allocation11 + $0x8] sm:$0xff]   ;;  %v2675_v36 = vld [vmem:[#allocation13 + $0x18] sm:$0xff]  }
 0x6cd   : > { %2470 = vmatpush3.bf16.msra.mxu1 %v2671_v28  ;;  %v2670_v37 = vld [vmem:[#allocation11] sm:$0xff]   ;;  %v2676_v39 = vld [vmem:[#allocation13 + $0x10] sm:$0xff]   ;;  %v2677_v40 = vld [vmem:[#allocation13 + $0x8] sm:$0xff]  }
 0x6ce   : > { %2471 = vmatprep.subr.bf16.mxu1 %v3071_v26  ;;  %v2678_v41 = vld [vmem:[#allocation13] sm:$0xff]   ;;  %v2202_v42 = vld [vmem:[%s3774_s22] ss:$0 sm:$0xff] }
 0x6cf   : > { %2452 = vmatpush3.bf16.msra.mxu0 %v2664_v24  ;;  %v2211_v51 = vld [vmem:[%s3775_s10] ss:$0 sm:$0xff] }
 0x6d0   : > { %2453 = vmatprep.subr.bf16.mxu0 %v3071_v26 }
 0x6d1   : > { %2472 = vmatpush3.bf16.msra.mxu1 %v2672_v30 }
 0x6d2   : > { %2473 = vmatprep.subr.bf16.mxu1 %v3071_v26 }
 0x6d3   : > { %2454 = vmatpush3.bf16.msra.mxu0 %v2665_v27 }
 0x6d4   : > { %2455 = vmatprep.subr.bf16.mxu0 %v3071_v26 }
 0x6d5   : > { %2474 = vmatpush3.bf16.msra.mxu1 %v2673_v32 }
 0x6d6   : > { %2475 = vmatprep.subr.bf16.mxu1 %v3071_v26 }
 0x6d7   : > { %2456 = vmatpush3.bf16.msra.mxu0 %v2666_v29 }
 0x6d8   : > { %2457 = vmatprep.subr.bf16.mxu0 %v3071_v26 }
 0x6d9   : > { %2476 = vmatpush3.bf16.msra.mxu1 %v2674_v34 }
 0x6da   : > { %2477 = vmatprep.subr.bf16.mxu1 %v3071_v26 }
 0x6db   : > { %2458 = vmatpush3.bf16.msra.mxu0 %v2667_v31 }
 0x6dc   : > { %2459 = vmatprep.subr.bf16.mxu0 %v3071_v26 }
 0x6dd   : > { %2478 = vmatpush3.bf16.msra.mxu1 %v2675_v36 }
 0x6de   : > { %2479 = vmatprep.subr.bf16.mxu1 %v3071_v26 }
 0x6df   : > { %2460 = vmatpush3.bf16.msra.mxu0 %v2668_v33 }
 0x6e0   : > { %2461 = vmatprep.subr.bf16.mxu0 %v3071_v26 }
 0x6e1   : > { %2480 = vmatpush3.bf16.msra.mxu1 %v2676_v39 }
 0x6e2   : > { %2481 = vmatprep.subr.bf16.mxu1 %v3071_v26 }
 0x6e3   : > { %2462 = vmatpush3.bf16.msra.mxu0 %v2669_v35 }
 0x6e4   : > { %2463 = vmatprep.subr.bf16.mxu0 %v3071_v26 }
 0x6e5   : > { %2482 = vmatpush3.bf16.msra.mxu1 %v2677_v40 }
 0x6e6   : > { %2483 = vmatprep.subr.bf16.mxu1 %v3071_v26 }
 0x6e7   : > { %2464 = vmatpush3.bf16.msra.mxu0 %v2670_v37 }
 0x6e9   : > { %2484 = vmatpush3.bf16.msra.mxu1 %v2678_v41 }
 0x6ea   : > { %2466 = vmatmul.mubr.bf16.vlgmr.msra.gmra.mxu0 %v1663_v38 }
 0x7aa   : > { %v1769_v43 = vpop.f32.mrf.mxu0 }
 0x7ab   : > { %v1770_v44 = vadd.f32 %v2202_v42, %v1769_v43 }
 0x7ac   : > { %v2467_v5 = vpop.f32.mrf.mxu0 }
 0x7ad   : > { %v1776_v48 = vmax.f32 %v1770_v44, 0.0 }
 0x7ae   : > { %v1772_v45 = vpop.f32.mrf.mxu0 }
 0x7af   : > { %v1773_v46 = vadd.f32 %v2202_v42, %v1772_v45 }
 0x7b0   : > { %v2468_v47 = vpop.f32.mrf.mxu0 }
 0x7b1   : > { %v1777_v49 = vmax.f32 %v1773_v46, 0.0 }
 0x7b3   : > { %v1778_v50 = vpack.c.bf16 %v1777_v49, %v1776_v48 }
 0x7b5   : > { %2486 = vmatmul.mubr.bf16.vlgmr.msra.gmra.mxu1 %v1778_v50 }
 0x875   : > { %v1884_v52 = vpop.f32.mrf.mxu1 }
 0x876   : > { %v1885_v53 = vadd.f32 %v2211_v51, %v1884_v52 }
 0x877   : > { %v2487_v54 = vpop.f32.mrf.mxu1 }
 0x878   : > { %v1891_v55 = vmax.f32 %v1885_v53, 0.0 }
 0x879   : > { %v1887_v56 = vpop.f32.mrf.mxu1 }
 0x87a   : > { %v1893_v57 = vmin.f32 %v1891_v55, 50.0  ;;  %v1888_v58 = vadd.f32 %v2211_v51, %v1887_v56 }
 0x87b   : > { %v2488_v59 = vpop.f32.mrf.mxu1 }
 0x87c   : > { %1895 = vst [vmem:[#allocation22] sm:$0xff] %v1893_v57  ;;  %v1892_v60 = vmax.f32 %v1888_v58, 0.0 }
 0x87e   : > { %v1894_v61 = vmin.f32 %v1892_v60, 50.0 }
 0x880   : > { %1896 = vst [vmem:[#allocation22 + $0x8] sm:$0xff] %v1894_v61 }
 0x881 PF: > { %s3776_s24 = sld [smem:[#allocation36_spill]]  ;;  %s3073_s20 = smov [#allocation22]  }
 0x882   : > { %s1903_s29 = sshll.u32 %s3073_s20, 4  ;;  %s1904_s29 = int_to_ptr.vmem [resolvable:$true] %s1903_s29 }
 0x883   : > { %s2969_s2 = scalar_lea.vmem %s1904_s29, 256  ;;  %p2976_p12 = scmp.lt.s32.totalorder %s1904_s29, %s1904_s29 }
 0x884   : > { %p2970_p3 = scmp.ne.s32.totalorder %s1904_s29, %s2969_s2  ;;  %p2977_p5 = scmp.lt.s32.totalorder %s2969_s2, %s2969_s2 }
 0x886   : > { %p2978_p6 = por %p2977_p5, %p2976_p12 }
 0x887   : > { %p2566_p13 = scmp.eq.s32.totalorder %s3776_s24, 1 }
 0x889   : > { %p2971_p1 = pnand %p2970_p3, %p2566_p13 }
 0x88b   : > { %p2972_p4 = pneg %p2971_p1 }
 0x88d   : > { %p2979_p8 = pnand %p2978_p6, %p2972_p4 }
 0x88f   : > { %2982 = shalt.err (!%p2979_p8)
}
 0x890   : > { %s3074_s5 = smov 128   ;;  %s3075_s26 = smov 8  }
 0x891   : > { %s3777_s9 = sld [smem:[#allocation50_spill]] }
 0x897   : > { %2520 = dma.vmem_to_hbm [thread:$0]  (%p2566_p13), %s1904_s29, 256, %s3777_s9, [#allocation7], %s3074_s5, %s3074_s5, %s3075_s26  }
 0x898   : > { %3036 = dma.done.wait (%p2566_p13), [#allocation7], 256  }
 0x899   : > { %3038 = vsyncadd (%p2566_p13), [#allocation7], 4294967040 }
 0x89a PF: > { %s3778_s24 = sld [smem:[#allocation39_spill]]  ;;  %s3781_s22 = smov %s3049_s23 }
 0x89b   : > { %s3779_s21 = sld [smem:[#allocation35_spill]] }
 0x89c   : > { %s3780_s0 = sld [smem:[#allocation40_spill]] }
 0x8a0   : > { %p36_p9 = scmp.ge.s32.totalorder %s3778_s24, 4  }
 0x8a2   : > { %s3782_s23 = smov %s3780_s0  ;;  %38 = sbr.rel (!%p36_p9) target bundleno = 22 (0x16), region = 201 }
 0x8a7   :  { %1919 = vsyncpa [#allocation6], 1 }
 0x8a8   :  { %1921 = vsyncpa [#allocation6 + $0x1], 1 }
 0x8a9   :  { %1922 = vsyncpa [#allocation9], 1 }
 0x8aa   :  { %1923 = vsyncpa [#allocation12], 1 }
 0x8ab   :  { %1924 = vsyncpa [#allocation15], 1 }
 0x8ac   :  { %1926 = vsyncpa [#allocation15 + $0x1], 1 }
 0x8ad   :  { %1927 = vsyncpa [#allocation18], 1 }
 0x8ae   :  { %1929 = vsyncpa [#allocation18 + $0x1], 1 }
 0x8af   :  { %1930 = vsyncpa [#allocation21], 1 }
 0x8b0   :  { %1932 = vsyncpa [#allocation21 + $0x1], 1 }
 0x8b1   :  { %1933 = vsyncpa [#allocation7], 1 }
 0x8b2   :  { %1935 = vsyncpa [#allocation7 + $0x1], 1 }
 0x8b3   :  { %1936 = vsyncmov [#allocation4] }
 0x8b6   :  { %s1937_s6 = vpop.sfrf %1936 }
 0x8b7   :  { %p2224_p0 = scmp.ne.s32.totalorder %s1937_s6, 0 }
 0x8b9   :  { %1941 = shalt.err (%p2224_p0)  }

</bundles_post_ra>
